<compile_context>
chip_gen: v7x
topology: tpu7x:2x2x1
jax: 0.10.0
libtpu: 0.0.40
codegen_flags: <defaults>
</compile_context>

<pallas_src>
import numpy as np
import jax
import jax.numpy as jnp
from jax.experimental import pallas as pl
from jax.experimental.pallas import tpu as pltpu


def _round_up(x, m):
    return (x + m - 1) // m * m


# ---------------------------------------------------------------------------
# Fused Pallas kernel: four lane-dense matmuls, biases added once each.
# ---------------------------------------------------------------------------
def cnn_fused_kernel(x_ref, w1_ref, b1_ref, w2_ref, b2_ref, w3_ref, b3_ref,
                     wfc_ref, bfc_ref, o_ref):
    """x_ref: (tile_n, C*P) channel-major flattened input tile.
       wN_ref: block-diagonal expanded conv weights; wfc_ref: (32*P, F_pad).
       o_ref: (tile_n, F_pad) final output tile (F padded to 128 lanes)."""
    x = x_ref[...]
    h = jnp.maximum(
        jnp.dot(x, w1_ref[...], preferred_element_type=jnp.float32)
        + b1_ref[...], 0.0)
    h = jnp.maximum(
        jnp.dot(h, w2_ref[...], preferred_element_type=jnp.float32)
        + b2_ref[...], 0.0)
    h = jnp.maximum(
        jnp.dot(h, w3_ref[...], preferred_element_type=jnp.float32)
        + b3_ref[...], 0.0)
    o_ref[...] = (jnp.dot(h, wfc_ref[...], preferred_element_type=jnp.float32)
                  + bfc_ref[...])


# ---------------------------------------------------------------------------
# Parameter init (PyTorch-layout, deterministic uniform fan-in scaling)
# ---------------------------------------------------------------------------
def init_torch_params(key, input_channels, input_length, width, num_features):
    P = input_length * width
    input_dims = 32 * P                      # == calc_input_dims()
    ks = jax.random.split(key, 8)

    def u(k, shape, fan_in):
        bound = 1.0 / np.sqrt(fan_in)
        return jax.random.uniform(k, shape, jnp.float32, -bound, bound)

    return {
        "conv1_w": u(ks[0], (32, input_channels, 1, 1), input_channels),
        "conv1_b": u(ks[1], (32,), input_channels),
        "conv2_w": u(ks[2], (16, 32, 1, 1), 32),
        "conv2_b": u(ks[3], (16,), 32),
        "conv3_w": u(ks[4], (32, 16, 1, 1), 16),
        "conv3_b": u(ks[5], (32,), 16),
        "fc_w":    u(ks[6], (num_features, input_dims), input_dims),
        "fc_b":    u(ks[7], (num_features,), input_dims),
    }


def prepare_kernel_params(tp, input_length, width, lane=128):
    """Fold the 1x1 conv stack into block-diagonal expanded weights acting on
    the channel-major flattened input, and pad the FC output dim to 128 lanes.
    Done once, statically, at parameter-prep time."""
    P = input_length * width
    F = tp["fc_w"].shape[0]
    F_pad = _round_up(max(F, lane), lane)

    def expand_conv(w):
        # w: (Cout, Cin, 1, 1) -> We: (Cin*P, Cout*P),
        # We[c*P + p, k*P + q] = w[k, c] * (p == q)
        w2d = w[:, :, 0, 0]                                   # (Cout, Cin)
        eye = jnp.eye(P, dtype=jnp.float32)
        we = jnp.einsum("kc,pq->cpkq", w2d, eye)
        return we.reshape(w2d.shape[1] * P, w2d.shape[0] * P)

    def expand_bias(b):
        # b: (Cout,) -> (1, Cout*P) with be[k*P + p] = b[k]
        return jnp.repeat(b, P).reshape(1, -1)

    # torch .view(N,-1) flat index is c*P + p, which is exactly fc_w's column
    # layout, so the FC weight needs no permutation — just transpose + pad.
    wfc = jnp.pad(tp["fc_w"].T, ((0, 0), (0, F_pad - F)))     # (32*P, F_pad)
    bfc = jnp.pad(tp["fc_b"], (0, F_pad - F)).reshape(1, F_pad)

    return {
        "w1": expand_conv(tp["conv1_w"]), "b1": expand_bias(tp["conv1_b"]),
        "w2": expand_conv(tp["conv2_w"]), "b2": expand_bias(tp["conv2_b"]),
        "w3": expand_conv(tp["conv3_w"]), "b3": expand_bias(tp["conv3_b"]),
        "wfc": wfc, "bfc": bfc,
    }


# ---------------------------------------------------------------------------
# Forward pass (single fused pallas_call)
# ---------------------------------------------------------------------------
def cnn_forward(x_nchw, kp, num_features):
    x = x_nchw.astype(jnp.float32)
    N = x.shape[0]
    CP = int(np.prod(x.shape[1:]))            # C*H*W (channel-major flatten)
    x_flat = x.reshape(N, CP)                 # free reshape of NCHW — no transpose

    F_pad = kp["bfc"].shape[1]

    # Batch tiling: tile_n multiple of 8 (sublane-aligned), capped at 512 rows
    # per step; split into >=2 tiles when possible so v7x's two TensorCores
    # both get work under dimension_semantics=("parallel",).
    n8 = _round_up(N, 8)
    tile_n = min(n8, 512)
    if n8 >= 16 and _round_up(N, tile_n) // tile_n < 2:
        tile_n = _round_up((n8 + 1) // 2, 8)
    n_pad = _round_up(N, tile_n)
    if n_pad != N:
        x_flat = jnp.pad(x_flat, ((0, n_pad - N), (0, 0)))
    grid = (n_pad // tile_n,)

    out = pl.pallas_call(
        cnn_fused_kernel,
        out_shape=jax.ShapeDtypeStruct((n_pad, F_pad), jnp.float32),
        grid=grid,
        in_specs=[
            pl.BlockSpec((tile_n, CP), lambda i: (i, 0)),      # x tile
            pl.BlockSpec(kp["w1"].shape, lambda i: (0, 0)),    # expanded conv1 w
            pl.BlockSpec(kp["b1"].shape, lambda i: (0, 0)),    # expanded conv1 b
            pl.BlockSpec(kp["w2"].shape, lambda i: (0, 0)),    # expanded conv2 w
            pl.BlockSpec(kp["b2"].shape, lambda i: (0, 0)),    # expanded conv2 b
            pl.BlockSpec(kp["w3"].shape, lambda i: (0, 0)),    # expanded conv3 w
            pl.BlockSpec(kp["b3"].shape, lambda i: (0, 0)),    # expanded conv3 b
            pl.BlockSpec(kp["wfc"].shape, lambda i: (0, 0)),   # fc weight (padded)
            pl.BlockSpec(kp["bfc"].shape, lambda i: (0, 0)),   # fc bias (padded)
        ],
        out_specs=pl.BlockSpec((tile_n, F_pad), lambda i: (i, 0)),
        compiler_params=pltpu.CompilerParams(
            dimension_semantics=("parallel",),
            vmem_limit_bytes=32 * 1024 * 1024),
    )(x_flat, kp["w1"], kp["b1"], kp["w2"], kp["b2"],
      kp["w3"], kp["b3"], kp["wfc"], kp["bfc"])

    return out[:N, :num_features]


cnn_forward_jit = jax.jit(cnn_forward, static_argnames=("num_features",))


# ---------------------------------------------------------------------------
# Pure-JAX reference (mirrors the PyTorch forward exactly; correctness only)
# ---------------------------------------------------------------------------
def cnn_forward_ref(x_nchw, tp):
    x = x_nchw.astype(jnp.float32)
    N = x.shape[0]

    def conv1x1(h, w, b):  # w: (Cout, Cin, 1, 1), b: (Cout,)
        y = jnp.einsum("nchw,kc->nkhw", h, w[:, :, 0, 0])
        return y + b[None, :, None, None]

    h = jnp.maximum(conv1x1(x, tp["conv1_w"], tp["conv1_b"]), 0.0)
    h = jnp.maximum(conv1x1(h, tp["conv2_w"], tp["conv2_b"]), 0.0)
    h = jnp.maximum(conv1x1(h, tp["conv3_w"], tp["conv3_b"]), 0.0)
    flat = h.reshape(N, -1)                   # channel-major, like .view(N, -1)
    return flat @ tp["fc_w"].T + tp["fc_b"]


if __name__ == "__main__":
    # Shapes consistent with the module: CNN(input_channels=4, input_length=16,
    # num_features=8); forward input is (N, C, L, 1).
    batch = 2
    input_channels = 4
    input_length = 16
    width = 1
    num_features = 8

    key = jax.random.PRNGKey(0)
    k_x, k_p = jax.random.split(key)
    x = jax.random.normal(k_x, (batch, input_channels, input_length, width),
                          dtype=jnp.float32)

    torch_params = init_torch_params(k_p, input_channels, input_length, width,
                                     num_features)
    kernel_params = prepare_kernel_params(torch_params, input_length, width)

    out = cnn_forward_jit(x, kernel_params, num_features=num_features)
    out = jax.block_until_ready(out)

    ref = cnn_forward_ref(x, torch_params)
    assert out.shape == (batch, num_features), out.shape
    max_err = np.abs(np.asarray(out) - np.asarray(ref)).max()
    assert np.allclose(np.asarray(out), np.asarray(ref), atol=1e-4, rtol=1e-4), max_err

    print("KERNEL_OK")
</pallas_src>

<mosaic_0001>
module attributes {stable_mosaic.version = 11 : i64} {
  func.func @cnn_fused_kernel(%arg0: i32, %arg1: memref<8x64xf32, #tpu.memory_space<vmem>>, %arg2: memref<64x512xf32, #tpu.memory_space<vmem>>, %arg3: memref<1x512xf32, #tpu.memory_space<vmem>>, %arg4: memref<512x256xf32, #tpu.memory_space<vmem>>, %arg5: memref<1x256xf32, #tpu.memory_space<vmem>>, %arg6: memref<256x512xf32, #tpu.memory_space<vmem>>, %arg7: memref<1x512xf32, #tpu.memory_space<vmem>>, %arg8: memref<512x128xf32, #tpu.memory_space<vmem>>, %arg9: memref<1x128xf32, #tpu.memory_space<vmem>>, %arg10: memref<8x128xf32, #tpu.memory_space<vmem>>) attributes {dimension_semantics = [#tpu.dimension_semantics<parallel>], iteration_bounds = array<i64: 1>, scalar_prefetch = 0 : i64, scratch_operands = 0 : i64, tpu.core_type = #tpu.core_type<tc>, window_params = [{transform_indices = @transform_0, window_bounds = array<i64: 8, 64>}, {pipeline_mode = #tpu.pipeline_mode<synchronous>, transform_indices = @transform_1, window_bounds = array<i64: 64, 512>}, {pipeline_mode = #tpu.pipeline_mode<synchronous>, transform_indices = @transform_2, window_bounds = array<i64: 1, 512>}, {pipeline_mode = #tpu.pipeline_mode<synchronous>, transform_indices = @transform_3, window_bounds = array<i64: 512, 256>}, {pipeline_mode = #tpu.pipeline_mode<synchronous>, transform_indices = @transform_4, window_bounds = array<i64: 1, 256>}, {pipeline_mode = #tpu.pipeline_mode<synchronous>, transform_indices = @transform_5, window_bounds = array<i64: 256, 512>}, {pipeline_mode = #tpu.pipeline_mode<synchronous>, transform_indices = @transform_6, window_bounds = array<i64: 1, 512>}, {pipeline_mode = #tpu.pipeline_mode<synchronous>, transform_indices = @transform_7, window_bounds = array<i64: 512, 128>}, {pipeline_mode = #tpu.pipeline_mode<synchronous>, transform_indices = @transform_8, window_bounds = array<i64: 1, 128>}, {transform_indices = @transform_9, window_bounds = array<i64: 8, 128>}]} {
    %c0 = arith.constant 0 : index
    %c0_0 = arith.constant 0 : index
    %0 = vector.load %arg1[%c0, %c0_0] : memref<8x64xf32, #tpu.memory_space<vmem>>, vector<8x64xf32>
    %c0_1 = arith.constant 0 : index
    %c0_2 = arith.constant 0 : index
    %1 = vector.load %arg2[%c0_1, %c0_2] : memref<64x512xf32, #tpu.memory_space<vmem>>, vector<64x512xf32>
    %cst = arith.constant dense<0.000000e+00> : vector<8x512xf32>
    %2 = tpu.matmul %0, %1, %cst {dimension_numbers = #tpu.dot_dimension_numbers<[1], [0], [0], [1], [0, 0, 1, 1], [], []>} : vector<8x64xf32>, vector<64x512xf32>, vector<8x512xf32> -> vector<8x512xf32>
    %c0_3 = arith.constant 0 : index
    %c0_4 = arith.constant 0 : index
    %3 = vector.load %arg3[%c0_3, %c0_4] : memref<1x512xf32, #tpu.memory_space<vmem>>, vector<1x512xf32>
    %4 = vector.broadcast %3 : vector<1x512xf32> to vector<8x512xf32>
    %5 = arith.addf %2, %4 : vector<8x512xf32>
    %cst_5 = arith.constant 0.000000e+00 : f32
    %6 = vector.broadcast %cst_5 : f32 to vector<8x512xf32>
    %7 = arith.maximumf %5, %6 : vector<8x512xf32>
    %c0_6 = arith.constant 0 : index
    %c0_7 = arith.constant 0 : index
    %8 = vector.load %arg4[%c0_6, %c0_7] : memref<512x256xf32, #tpu.memory_space<vmem>>, vector<512x256xf32>
    %cst_8 = arith.constant dense<0.000000e+00> : vector<8x256xf32>
    %9 = tpu.matmul %7, %8, %cst_8 {dimension_numbers = #tpu.dot_dimension_numbers<[1], [0], [0], [1], [0, 0, 1, 1], [], []>} : vector<8x512xf32>, vector<512x256xf32>, vector<8x256xf32> -> vector<8x256xf32>
    %c0_9 = arith.constant 0 : index
    %c0_10 = arith.constant 0 : index
    %10 = vector.load %arg5[%c0_9, %c0_10] : memref<1x256xf32, #tpu.memory_space<vmem>>, vector<1x256xf32>
    %11 = vector.broadcast %10 : vector<1x256xf32> to vector<8x256xf32>
    %12 = arith.addf %9, %11 : vector<8x256xf32>
    %cst_11 = arith.constant 0.000000e+00 : f32
    %13 = vector.broadcast %cst_11 : f32 to vector<8x256xf32>
    %14 = arith.maximumf %12, %13 : vector<8x256xf32>
    %c0_12 = arith.constant 0 : index
    %c0_13 = arith.constant 0 : index
    %15 = vector.load %arg6[%c0_12, %c0_13] : memref<256x512xf32, #tpu.memory_space<vmem>>, vector<256x512xf32>
    %cst_14 = arith.constant dense<0.000000e+00> : vector<8x512xf32>
    %16 = tpu.matmul %14, %15, %cst_14 {dimension_numbers = #tpu.dot_dimension_numbers<[1], [0], [0], [1], [0, 0, 1, 1], [], []>} : vector<8x256xf32>, vector<256x512xf32>, vector<8x512xf32> -> vector<8x512xf32>
    %c0_15 = arith.constant 0 : index
    %c0_16 = arith.constant 0 : index
    %17 = vector.load %arg7[%c0_15, %c0_16] : memref<1x512xf32, #tpu.memory_space<vmem>>, vector<1x512xf32>
    %18 = vector.broadcast %17 : vector<1x512xf32> to vector<8x512xf32>
    %19 = arith.addf %16, %18 : vector<8x512xf32>
    %cst_17 = arith.constant 0.000000e+00 : f32
    %20 = vector.broadcast %cst_17 : f32 to vector<8x512xf32>
    %21 = arith.maximumf %19, %20 : vector<8x512xf32>
    %c0_18 = arith.constant 0 : index
    %c0_19 = arith.constant 0 : index
    %22 = vector.load %arg8[%c0_18, %c0_19] : memref<512x128xf32, #tpu.memory_space<vmem>>, vector<512x128xf32>
    %cst_20 = arith.constant dense<0.000000e+00> : vector<8x128xf32>
    %23 = tpu.matmul %21, %22, %cst_20 {dimension_numbers = #tpu.dot_dimension_numbers<[1], [0], [0], [1], [0, 0, 1, 1], [], []>} : vector<8x512xf32>, vector<512x128xf32>, vector<8x128xf32> -> vector<8x128xf32>
    %c0_21 = arith.constant 0 : index
    %c0_22 = arith.constant 0 : index
    %24 = vector.load %arg9[%c0_21, %c0_22] : memref<1x128xf32, #tpu.memory_space<vmem>>, vector<1x128xf32>
    %25 = vector.broadcast %24 : vector<1x128xf32> to vector<8x128xf32>
    %26 = arith.addf %23, %25 : vector<8x128xf32>
    %c0_23 = arith.constant 0 : index
    %c0_24 = arith.constant 0 : index
    %27 = vector.load %arg10[%c0_23, %c0_24] : memref<8x128xf32, #tpu.memory_space<vmem>>, vector<8x128xf32>
    tpu.vector_store %arg10[%c0_23, %c0_24], %26 {strides = array<i32>} : memref<8x128xf32, #tpu.memory_space<vmem>>, vector<8x128xf32>,
    return
  }
  func.func @transform_0(%arg0: i32) -> (i32, i32) {
    %c0_i32 = arith.constant 0 : i32
    %c0_i32_0 = arith.constant 0 : i32
    return %arg0, %c0_i32 : i32, i32
  }
  func.func @transform_1(%arg0: i32) -> (i32, i32) {
    %c0_i32 = arith.constant 0 : i32
    %c0_i32_0 = arith.constant 0 : i32
    %c0_i32_1 = arith.constant 0 : i32
    return %c0_i32, %c0_i32_0 : i32, i32
  }
  func.func @transform_2(%arg0: i32) -> (i32, i32) {
    %c0_i32 = arith.constant 0 : i32
    %c0_i32_0 = arith.constant 0 : i32
    %c0_i32_1 = arith.constant 0 : i32
    return %c0_i32, %c0_i32_0 : i32, i32
  }
  func.func @transform_3(%arg0: i32) -> (i32, i32) {
    %c0_i32 = arith.constant 0 : i32
    %c0_i32_0 = arith.constant 0 : i32
    %c0_i32_1 = arith.constant 0 : i32
    return %c0_i32, %c0_i32_0 : i32, i32
  }
  func.func @transform_4(%arg0: i32) -> (i32, i32) {
    %c0_i32 = arith.constant 0 : i32
    %c0_i32_0 = arith.constant 0 : i32
    %c0_i32_1 = arith.constant 0 : i32
    return %c0_i32, %c0_i32_0 : i32, i32
  }
  func.func @transform_5(%arg0: i32) -> (i32, i32) {
    %c0_i32 = arith.constant 0 : i32
    %c0_i32_0 = arith.constant 0 : i32
    %c0_i32_1 = arith.constant 0 : i32
    return %c0_i32, %c0_i32_0 : i32, i32
  }
  func.func @transform_6(%arg0: i32) -> (i32, i32) {
    %c0_i32 = arith.constant 0 : i32
    %c0_i32_0 = arith.constant 0 : i32
    %c0_i32_1 = arith.constant 0 : i32
    return %c0_i32, %c0_i32_0 : i32, i32
  }
  func.func @transform_7(%arg0: i32) -> (i32, i32) {
    %c0_i32 = arith.constant 0 : i32
    %c0_i32_0 = arith.constant 0 : i32
    %c0_i32_1 = arith.constant 0 : i32
    return %c0_i32, %c0_i32_0 : i32, i32
  }
  func.func @transform_8(%arg0: i32) -> (i32, i32) {
    %c0_i32 = arith.constant 0 : i32
    %c0_i32_0 = arith.constant 0 : i32
    %c0_i32_1 = arith.constant 0 : i32
    return %c0_i32, %c0_i32_0 : i32, i32
  }
  func.func @transform_9(%arg0: i32) -> (i32, i32) {
    %c0_i32 = arith.constant 0 : i32
    %c0_i32_0 = arith.constant 0 : i32
    return %arg0, %c0_i32 : i32, i32
  }
}

</mosaic_0001>

<bundles_post_ra>
// kernel: cnn_forward.1
= control target key start
LH: loop header
LB: loop body
LE: loop exit
PB: predicated region body
PF: predicated region fallthrough
CT: control target
= control target key end

     0   :  { %14 = vsyncpa [#allocation3], 0  ;;  %s1801_s0 = inlined_call_operand.vmem [shape: f32[8,64], index: 0, kind: input, shape index: {}]   ;;  %s1802_s1 = inlined_call_operand.hbm [shape: f32[64,512], index: 1, kind: input, shape index: {}]   ;;  %s1803_s2 = inlined_call_operand.vmem [shape: f32[1,512], index: 2, kind: input, shape index: {}]   ;;  %s1804_s3 = inlined_call_operand.hbm [shape: f32[512,256], index: 3, kind: input, shape index: {}]   ;;  %s1805_s4 = inlined_call_operand.vmem [shape: f32[1,256], index: 4, kind: input, shape index: {}]   ;;  %s1806_s5 = inlined_call_operand.hbm [shape: f32[256,512], index: 5, kind: input, shape index: {}]   ;;  %s1807_s6 = inlined_call_operand.vmem [shape: f32[1,512], index: 6, kind: input, shape index: {}]   ;;  %s1808_s7 = inlined_call_operand.hbm [shape: f32[512,128], index: 7, kind: input, shape index: {}]   ;;  %s1809_s8 = inlined_call_operand.vmem [shape: f32[1,128], index: 8, kind: input, shape index: {}]   ;;  %s1810_s9 = inlined_call_operand.vmem [shape: f32[8,128], index: 9, kind: output, shape index: {}]  }
   0x1   :  { %15 = vsyncpa [#allocation5], 0 }
   0x2   :  { %16 = vsyncpa [#allocation8], 0  ;;  %s1625_s30 = smov [#allocation4]   ;;  %s1531_s13 = scalar_lea.hbm %s1804_s3, 16384 }
   0x3   :  { %s38_s10 = sshll.u32 %s1625_s30, 4  ;;  %p1532_p0 = scmp.ne.s32.totalorder %s1804_s3, %s1531_s13  ;;  %s39_s10 = int_to_ptr.vmem [resolvable:$true] %s38_s10 }
   0x4   :  { %p1535_p1 = scmp.lt.u32.totalorder %s1531_s13, %s1804_s3 }
   0x6   :  { %p1537_p2 = pnand %p1535_p1, %p1532_p0 }
   0x8   :  { %1540 = shalt.err (!%p1537_p2)
}
   0x9   :  { %s1541_s18 = scalar_lea.vmem %s39_s10, 16384  ;;  %p1546_p4 = scmp.lt.s32.totalorder %s39_s10, %s39_s10 }
   0xa   :  { %p1542_p3 = scmp.ne.s32.totalorder %s39_s10, %s1541_s18  ;;  %p1547_p5 = scmp.lt.s32.totalorder %s1541_s18, %s1541_s18 }
   0xc   :  { %p1548_p6 = por %p1547_p5, %p1546_p4 }
   0xe   :  { %p1549_p7 = pnand %p1548_p6, %p1542_p3 }
  0x10   :  { %1552 = shalt.err (!%p1549_p7)
}
  0x11   :  { %s1626_s19 = smov 256   ;;  %s1627_s20 = smov 16  }
  0x12   :  { %44 = dma.hbm_to_vmem [thread:$0]  %s1804_s3, 16384, %s39_s10, [#allocation5], %s1626_s19, %s1626_s19, %s1627_s20  }
  0x13   :  { %s1628_s23 = smov [#allocation2]   ;;  %s1553_s27 = scalar_lea.hbm %s1802_s1, 4096 }
  0x14   :  { %s24_s24 = sshll.u32 %s1628_s23, 4  ;;  %p1554_p8 = scmp.ne.s32.totalorder %s1802_s1, %s1553_s27  ;;  %s25_s24 = int_to_ptr.vmem [resolvable:$true] %s24_s24 }
  0x15   :  { %p1557_p9 = scmp.lt.u32.totalorder %s1553_s27, %s1802_s1 }
  0x17   :  { %p1559_p10 = pnand %p1557_p9, %p1554_p8 }
  0x19   :  { %1562 = shalt.err (!%p1559_p10)
}
  0x1a   :  { %s1563_s12 = scalar_lea.vmem %s25_s24, 4096  ;;  %p1568_p12 = scmp.lt.s32.totalorder %s25_s24, %s25_s24 }
  0x1b   :  { %p1564_p11 = scmp.ne.s32.totalorder %s25_s24, %s1563_s12  ;;  %p1569_p13 = scmp.lt.s32.totalorder %s1563_s12, %s1563_s12 }
  0x1d   :  { %p1570_p0 = por %p1569_p13, %p1568_p12 }
  0x1f   :  { %p1571_p1 = pnand %p1570_p0, %p1564_p11 }
  0x21   :  { %1574 = shalt.err (!%p1571_p1)
}
  0x22   :  { %s1629_s3 = smov 512   ;;  %s1630_s10 = smov 32  }
  0x23   :  { %30 = dma.hbm_to_vmem [thread:$0]  %s1802_s1, 4096, %s25_s24, [#allocation3], %s1629_s3, %s1629_s3, %s1630_s10  }
  0x24   :  { %s1631_s15 = smov [#allocation6]   ;;  %s1632_s17 = smov [#allocation7]  }
  0x25   :  { %s52_s16 = sshll.u32 %s1631_s15, 4  ;;  %s66_s18 = sshll.u32 %s1632_s17, 4  ;;  %s53_s16 = int_to_ptr.vmem [resolvable:$true] %s52_s16  ;;  %s1710_s18 = int_to_ptr.vmem [resolvable:$true] %s66_s18 }
  0x26   :  { %s1575_s21 = scalar_lea.hbm %s1806_s5, 16384 }
  0x27   :  { %p1576_p2 = scmp.ne.s32.totalorder %s1806_s5, %s1575_s21  ;;  %p1579_p3 = scmp.lt.u32.totalorder %s1575_s21, %s1806_s5 }
  0x29   :  { %p1581_p4 = pnand %p1579_p3, %p1576_p2 }
  0x2b   :  { %1584 = shalt.err (!%p1581_p4)
}
  0x2c   :  { %s1585_s1 = scalar_lea.vmem %s53_s16, 16384  ;;  %p1590_p6 = scmp.lt.s32.totalorder %s53_s16, %s53_s16 }
  0x2d   :  { %p1586_p5 = scmp.ne.s32.totalorder %s53_s16, %s1585_s1  ;;  %p1591_p7 = scmp.lt.s32.totalorder %s1585_s1, %s1585_s1 }
  0x2f   :  { %p1592_p8 = por %p1591_p7, %p1590_p6 }
  0x31   :  { %p1593_p9 = pnand %p1592_p8, %p1586_p5 }
  0x33   :  { %1596 = shalt.err (!%p1593_p9)
}
  0x34   :  { %58 = dma.hbm_to_vmem [thread:$0]  %s1806_s5, 16384, %s53_s16, [#allocation5], %s1629_s3, %s1629_s3, %s1630_s10  }
  0x35   :  { %s1597_s30 = scalar_lea.hbm %s1808_s7, 8192 }
  0x36   :  { %p1598_p10 = scmp.ne.s32.totalorder %s1808_s7, %s1597_s30  ;;  %p1601_p11 = scmp.lt.u32.totalorder %s1597_s30, %s1808_s7 }
  0x38   :  { %p1603_p12 = pnand %p1601_p11, %p1598_p10 }
  0x3a   :  { %1606 = shalt.err (!%p1603_p12)
}
  0x3b   :  { %s1607_s15 = scalar_lea.vmem %s1710_s18, 8192  ;;  %p1612_p0 = scmp.lt.s32.totalorder %s1710_s18, %s1710_s18 }
  0x3c   :  { %p1608_p13 = scmp.ne.s32.totalorder %s1710_s18, %s1607_s15  ;;  %p1613_p1 = scmp.lt.s32.totalorder %s1607_s15, %s1607_s15 }
  0x3e   :  { %p1614_p2 = por %p1613_p1, %p1612_p0 }
  0x40   :  { %p1615_p3 = pnand %p1614_p2, %p1608_p13 }
  0x42   :  { %1618 = shalt.err (!%p1615_p3)
}
  0x43   :  { %s1633_s5 = smov 128   ;;  %s1634_s3 = smov 8  }
  0x44   :  { %72 = dma.hbm_to_vmem [thread:$0]  %s1808_s7, 8192, %s1710_s18, [#allocation8], %s1633_s5, %s1633_s5, %s1634_s3  }
  0x45   :  { %1619 = dma.done.wait [#allocation3], 4096  }
  0x46   :  { %1620 = vsyncadd [#allocation3], 4294963200 }
  0x47   :  { %1621 = dma.done.wait [#allocation5], 32768  }
  0x48   :  { %1622 = vsyncadd [#allocation5], 4294934528 }
  0x49   :  { %1623 = dma.done.wait [#allocation8], 8192  }
  0x4a   :  { %1624 = vsyncadd [#allocation8], 4294959104  ;;  %v1635_v0 = vmov 0.0   ;;  %v89_v1 = vld [vmem:[#allocation2 + $0x8] sm:$0xff]  ;;  %v88_v3 = vld [vmem:[#allocation2] sm:$0xff]  ;;  %vm142_vm0 = vcmask 523264  }
  0x4b   :  { %210 = vmatprep.mubr.f32.mxu0 %v1635_v0  ;;  %281 = vmatprep.mubr.f32.mxu1 %v1635_v0  ;;  %v93_v2 = vld [vmem:[#allocation2 + $0x28] sm:$0xff]  ;;  %v92_v5 = vld [vmem:[#allocation2 + $0x20] sm:$0xff]  ;;  %v91_v20 = vld [vmem:[#allocation2 + $0x18] sm:$0xff] }
  0x4c   :  { %v1164_v4 = vpack.c.bf16 %v93_v2, %v89_v1  ;;  %v97_v6 = vld [vmem:[#allocation2 + $0x48] sm:$0xff]  ;;  %v1166_v8 = vpack.c.bf16 %v92_v5, %v88_v3  ;;  %v96_v10 = vld [vmem:[#allocation2 + $0x40] sm:$0xff]  ;;  %v95_v21 = vld [vmem:[#allocation2 + $0x38] sm:$0xff] }
  0x4d   :  { %v101_v7 = vld [vmem:[#allocation2 + $0x68] sm:$0xff]  ;;  %v100_v11 = vld [vmem:[#allocation2 + $0x60] sm:$0xff]  ;;  %v90_v22 = vld [vmem:[#allocation2 + $0x10] sm:$0xff]  ;;  %v1180_v24 = vpack.c.bf16 %v95_v21, %v91_v20 }
  0x4e   :  { %v1168_v9 = vpack.c.bf16 %v101_v7, %v97_v6  ;;  %v105_v12 = vld [vmem:[#allocation2 + $0x88] sm:$0xff]  ;;  %1165 = vmatprep.subr.bf16.mxu0 %v1164_v4  ;;  %v1170_v14 = vpack.c.bf16 %v100_v11, %v96_v10  ;;  %v104_v15 = vld [vmem:[#allocation2 + $0x80] sm:$0xff]  ;;  %v94_v23 = vld [vmem:[#allocation2 + $0x30] sm:$0xff] }
  0x4f   :  { %v109_v13 = vld [vmem:[#allocation2 + $0xa8] sm:$0xff]  ;;  %1167 = vmatpush1.bf16.msra.mxu0 %v1166_v8  ;;  %v108_v16 = vld [vmem:[#allocation2 + $0xa0] sm:$0xff]  ;;  %v1182_v25 = vpack.c.bf16 %v94_v23, %v90_v22  ;;  %v99_v26 = vld [vmem:[#allocation2 + $0x58] sm:$0xff]  ;;  %1181 = vmatprep.subr.bf16.mxu1 %v1180_v24 }
  0x50   :  { %1169 = vmatprep.subr.bf16.mxu0 %v1168_v9  ;;  %v1172_v17 = vpack.c.bf16 %v109_v13, %v105_v12  ;;  %v113_v18 = vld [vmem:[#allocation2 + $0xc8] sm:$0xff]  ;;  %v103_v27 = vld [vmem:[#allocation2 + $0x78] sm:$0xff]  ;;  %v98_v28 = vld [vmem:[#allocation2 + $0x50] sm:$0xff]  ;;  %v1174_v29 = vpack.c.bf16 %v108_v16, %v104_v15 }
  0x51   :  { %v117_v19 = vld [vmem:[#allocation2 + $0xe8] sm:$0xff]  ;;  %v1184_v30 = vpack.c.bf16 %v103_v27, %v99_v26  ;;  %v102_v31 = vld [vmem:[#allocation2 + $0x70] sm:$0xff]  ;;  %v107_v32 = vld [vmem:[#allocation2 + $0x98] sm:$0xff]  ;;  %1183 = vmatpush1.bf16.msra.mxu1 %v1182_v25 }
  0x52   :  { %v111_v33 = vld [vmem:[#allocation2 + $0xb8] sm:$0xff]  ;;  %v1176_v34 = vpack.c.bf16 %v117_v19, %v113_v18  ;;  %v112_v35 = vld [vmem:[#allocation2 + $0xc0] sm:$0xff]  ;;  %v1186_v37 = vpack.c.bf16 %v102_v31, %v98_v28  ;;  %v106_v38 = vld [vmem:[#allocation2 + $0x90] sm:$0xff] }
  0x53   :  { %1171 = vmatpush1.bf16.msra.mxu0 %v1170_v14  ;;  %v116_v36 = vld [vmem:[#allocation2 + $0xe0] sm:$0xff]  ;;  %1185 = vmatprep.subr.bf16.mxu1 %v1184_v30  ;;  %v1188_v39 = vpack.c.bf16 %v111_v33, %v107_v32  ;;  %v110_v40 = vld [vmem:[#allocation2 + $0xb0] sm:$0xff]  ;;  %v293_v41 = vld [vmem:[#allocation4 + $0x8] sm:$0xff] }
  0x54   :  { %1173 = vmatprep.subr.bf16.mxu0 %v1172_v17  ;;  %v295_v42 = vld [vmem:[#allocation4 + $0x18] sm:$0xff]  ;;  %v1178_v43 = vpack.c.bf16 %v116_v36, %v112_v35  ;;  %v292_v47 = vld [vmem:[#allocation4] sm:$0xff]  ;;  %v294_v48 = vld [vmem:[#allocation4 + $0x10] sm:$0xff]  ;;  %v1190_v49 = vpack.c.bf16 %v110_v40, %v106_v38 }
  0x55   :  { %v115_v44 = vld [vmem:[#allocation2 + $0xd8] sm:$0xff]  ;;  %v1196_v46 = vpack.c.bf16 %v295_v42, %v293_v41  ;;  %1187 = vmatpush1.bf16.msra.mxu1 %v1186_v37  ;;  %v297_v50 = vld [vmem:[#allocation4 + $0x28] sm:$0xff]  ;;  %v114_v53 = vld [vmem:[#allocation2 + $0xd0] sm:$0xff]  ;;  %v1198_v56 = vpack.c.bf16 %v294_v48, %v292_v47 }
  0x56   :  { %v119_v45 = vld [vmem:[#allocation2 + $0xf8] sm:$0xff]  ;;  %1189 = vmatprep.subr.bf16.mxu1 %v1188_v39  ;;  %v118_v54 = vld [vmem:[#allocation2 + $0xf0] sm:$0xff]  ;;  %v87_v55 = vld [vmem:[%s1801_s0] sm:$0xff] }
  0x57   :  { %1175 = vmatpush1.bf16.msra.mxu0 %v1174_v29  ;;  %v299_v51 = vld [vmem:[#allocation4 + $0x38] sm:$0xff]  ;;  %v1192_v52 = vpack.c.bf16 %v119_v45, %v115_v44  ;;  %v296_v58 = vld [vmem:[#allocation4 + $0x20] sm:$0xff]  ;;  %v298_v59 = vld [vmem:[#allocation4 + $0x30] sm:$0xff]  ;;  %v1194_v60 = vpack.c.bf16 %v118_v54, %v114_v53 }
  0x58   :  { %1177 = vmatprep.subr.bf16.mxu0 %v1176_v34  ;;  %v1200_v57 = vpack.c.bf16 %v299_v51, %v297_v50  ;;  %v301_v61 = vld [vmem:[#allocation4 + $0x48] sm:$0xff]  ;;  %v303_v62 = vld [vmem:[#allocation4 + $0x58] sm:$0xff]  ;;  %v1202_v63 = vpack.c.bf16 %v298_v59, %v296_v58  ;;  %v300_v1 = vld [vmem:[#allocation4 + $0x40] sm:$0xff] }
  0x59   :  { %1191 = vmatpush1.bf16.msra.mxu1 %v1190_v49  ;;  %v1204_v0 = vpack.c.bf16 %v303_v62, %v301_v61  ;;  %v302_v2 = vld [vmem:[#allocation4 + $0x50] sm:$0xff]  ;;  %v305_v3 = vld [vmem:[#allocation4 + $0x68] sm:$0xff]  ;;  %v307_v4 = vld [vmem:[#allocation4 + $0x78] sm:$0xff] }
  0x5a   :  { %1193 = vmatprep.subr.bf16.mxu1 %v1192_v52  ;;  %v1206_v5 = vpack.c.bf16 %v302_v2, %v300_v1  ;;  %v1208_v6 = vpack.c.bf16 %v307_v4, %v305_v3  ;;  %v304_v7 = vld [vmem:[#allocation4 + $0x60] sm:$0xff]  ;;  %v306_v8 = vld [vmem:[#allocation4 + $0x70] sm:$0xff]  ;;  %v309_v9 = vld [vmem:[#allocation4 + $0x88] sm:$0xff] }
  0x5b   :  { %1179 = vmatpush1.bf16.msra.mxu0 %v1178_v43  ;;  %v311_v10 = vld [vmem:[#allocation4 + $0x98] sm:$0xff]  ;;  %v1210_v11 = vpack.c.bf16 %v306_v8, %v304_v7  ;;  %v308_v13 = vld [vmem:[#allocation4 + $0x80] sm:$0xff]  ;;  %v310_v14 = vld [vmem:[#allocation4 + $0x90] sm:$0xff] }
  0x5c   :  { %1197 = vmatprep.subr.bf16.mxu0 %v1196_v46  ;;  %v1212_v12 = vpack.c.bf16 %v311_v10, %v309_v9  ;;  %v313_v15 = vld [vmem:[#allocation4 + $0xa8] sm:$0xff]  ;;  %v315_v16 = vld [vmem:[#allocation4 + $0xb8] sm:$0xff]  ;;  %v1214_v17 = vpack.c.bf16 %v310_v14, %v308_v13  ;;  %v312_v19 = vld [vmem:[#allocation4 + $0xa0] sm:$0xff] }
  0x5d   :  { %1195 = vmatpush1.bf16.msra.mxu1 %v1194_v60  ;;  %v1216_v18 = vpack.c.bf16 %v315_v16, %v313_v15  ;;  %v314_v20 = vld [vmem:[#allocation4 + $0xb0] sm:$0xff]  ;;  %v317_v21 = vld [vmem:[#allocation4 + $0xc8] sm:$0xff]  ;;  %v319_v22 = vld [vmem:[#allocation4 + $0xd8] sm:$0xff] }
  0x5e   :  { %1091 = vmatmul.mubr.msk.f32.vlgmr.msra.gmra.mrb[0].mxu0 %vm142_vm0, %v87_v55  ;;  %v1218_v23 = vpack.c.bf16 %v314_v20, %v312_v19  ;;  %v1220_v24 = vpack.c.bf16 %v319_v22, %v317_v21  ;;  %v316_v25 = vld [vmem:[#allocation4 + $0xc0] sm:$0xff]  ;;  %v318_v26 = vld [vmem:[#allocation4 + $0xd0] sm:$0xff]  ;;  %v321_v27 = vld [vmem:[#allocation4 + $0xe8] sm:$0xff] }
  0x5f   :  { %1199 = vmatpush1.bf16.msra.mxu0 %v1198_v56  ;;  %v323_v28 = vld [vmem:[#allocation4 + $0xf8] sm:$0xff]  ;;  %v1222_v29 = vpack.c.bf16 %v318_v26, %v316_v25  ;;  %v320_v31 = vld [vmem:[#allocation4 + $0xe0] sm:$0xff]  ;;  %v322_v32 = vld [vmem:[#allocation4 + $0xf0] sm:$0xff] }
  0x60   :  { %1201 = vmatprep.subr.bf16.mxu0 %v1200_v57  ;;  %1092 = vmatmul.mubr.msk.f32.vlgmr.msra.gmra.mrb[0].mxu1 %vm142_vm0, %v87_v55  ;;  %v1224_v30 = vpack.c.bf16 %v323_v28, %v321_v27  ;;  %v325_v33 = vld [vmem:[#allocation4 + $0x108] sm:$0xff]  ;;  %v327_v34 = vld [vmem:[#allocation4 + $0x118] sm:$0xff]  ;;  %v1226_v35 = vpack.c.bf16 %v322_v32, %v320_v31  ;;  %v324_v37 = vld [vmem:[#allocation4 + $0x100] sm:$0xff] }
  0x61   :  { %v1228_v36 = vpack.c.bf16 %v327_v34, %v325_v33  ;;  %v326_v38 = vld [vmem:[#allocation4 + $0x110] sm:$0xff]  ;;  %v329_v39 = vld [vmem:[#allocation4 + $0x128] sm:$0xff]  ;;  %v331_v40 = vld [vmem:[#allocation4 + $0x138] sm:$0xff] }
  0x62   :  { %v1230_v41 = vpack.c.bf16 %v326_v38, %v324_v37  ;;  %v1232_v42 = vpack.c.bf16 %v331_v40, %v329_v39  ;;  %v328_v43 = vld [vmem:[#allocation4 + $0x120] sm:$0xff]  ;;  %v330_v44 = vld [vmem:[#allocation4 + $0x130] sm:$0xff]  ;;  %v333_v45 = vld [vmem:[#allocation4 + $0x148] sm:$0xff] }
  0x63   :  { %1203 = vmatpush1.bf16.msra.mxu0 %v1202_v63  ;;  %v335_v46 = vld [vmem:[#allocation4 + $0x158] sm:$0xff]  ;;  %v1234_v47 = vpack.c.bf16 %v330_v44, %v328_v43  ;;  %v332_v49 = vld [vmem:[#allocation4 + $0x140] sm:$0xff]  ;;  %v334_v50 = vld [vmem:[#allocation4 + $0x150] sm:$0xff] }
  0x64   :  { %1205 = vmatprep.subr.bf16.mxu0 %v1204_v0  ;;  %v1236_v48 = vpack.c.bf16 %v335_v46, %v333_v45  ;;  %v337_v51 = vld [vmem:[#allocation4 + $0x168] sm:$0xff]  ;;  %v339_v52 = vld [vmem:[#allocation4 + $0x178] sm:$0xff]  ;;  %v1238_v53 = vpack.c.bf16 %v334_v50, %v332_v49  ;;  %v336_v55 = vld [vmem:[#allocation4 + $0x160] sm:$0xff] }
  0x65   :  { %v1240_v54 = vpack.c.bf16 %v339_v52, %v337_v51  ;;  %v338_v56 = vld [vmem:[#allocation4 + $0x170] sm:$0xff]  ;;  %v341_v57 = vld [vmem:[#allocation4 + $0x188] sm:$0xff]  ;;  %v343_v58 = vld [vmem:[#allocation4 + $0x198] sm:$0xff] }
  0x66   :  { %v1242_v59 = vpack.c.bf16 %v338_v56, %v336_v55  ;;  %v1244_v60 = vpack.c.bf16 %v343_v58, %v341_v57  ;;  %v340_v61 = vld [vmem:[#allocation4 + $0x180] sm:$0xff]  ;;  %v342_v62 = vld [vmem:[#allocation4 + $0x190] sm:$0xff]  ;;  %v345_v63 = vld [vmem:[#allocation4 + $0x1a8] sm:$0xff] }
  0x67   :  { %1207 = vmatpush1.bf16.msra.mxu0 %v1206_v5  ;;  %v347_v0 = vld [vmem:[#allocation4 + $0x1b8] sm:$0xff]  ;;  %v1246_v1 = vpack.c.bf16 %v342_v62, %v340_v61  ;;  %v344_v3 = vld [vmem:[#allocation4 + $0x1a0] sm:$0xff]  ;;  %v346_v4 = vld [vmem:[#allocation4 + $0x1b0] sm:$0xff] }
  0x68   :  { %1209 = vmatprep.subr.bf16.mxu0 %v1208_v6  ;;  %v1248_v2 = vpack.c.bf16 %v347_v0, %v345_v63  ;;  %v349_v5 = vld [vmem:[#allocation4 + $0x1c8] sm:$0xff]  ;;  %v351_v6 = vld [vmem:[#allocation4 + $0x1d8] sm:$0xff]  ;;  %v1250_v7 = vpack.c.bf16 %v346_v4, %v344_v3  ;;  %v348_v9 = vld [vmem:[#allocation4 + $0x1c0] sm:$0xff] }
  0x69   :  { %v1252_v8 = vpack.c.bf16 %v351_v6, %v349_v5  ;;  %v350_v10 = vld [vmem:[#allocation4 + $0x1d0] sm:$0xff]  ;;  %v355_v13 = vld [vmem:[#allocation4 + $0x1f8] sm:$0xff]  ;;  %v352_v15 = vld [vmem:[#allocation4 + $0x1e0] sm:$0xff] }
  0x6a   :  { %v354_v16 = vld [vmem:[#allocation4 + $0x1f0] sm:$0xff]  ;;  %v359_v19 = vld [vmem:[#allocation4 + $0x218] sm:$0xff]  ;;  %v577_v21 = vld [vmem:[#allocation6 + $0x8] sm:$0xff] }
  0x6b   :  { %1211 = vmatpush1.bf16.msra.mxu0 %v1210_v11  ;;  %v1254_v11 = vpack.c.bf16 %v350_v10, %v348_v9  ;;  %v581_v22 = vld [vmem:[#allocation6 + $0x28] sm:$0xff]  ;;  %v580_v25 = vld [vmem:[#allocation6 + $0x20] sm:$0xff] }
  0x6c   :  { %1213 = vmatprep.subr.bf16.mxu0 %v1212_v12  ;;  %v353_v12 = vld [vmem:[#allocation4 + $0x1e8] sm:$0xff]  ;;  %v588_v31 = vld [vmem:[#allocation6 + $0x60] sm:$0xff] }
  0x6d   :  { %v1256_v14 = vpack.c.bf16 %v355_v13, %v353_v12  ;;  %v585_v26 = vld [vmem:[#allocation6 + $0x48] sm:$0xff]  ;;  %v596_v37 = vld [vmem:[#allocation6 + $0xa0] sm:$0xff] }
  0x6e   :  { %v589_v27 = vld [vmem:[#allocation6 + $0x68] sm:$0xff]  ;;  %v604_v43 = vld [vmem:[#allocation6 + $0xe0] sm:$0xff] }
  0x6f   :  { %1215 = vmatpush1.bf16.msra.mxu0 %v1214_v17  ;;  %v1258_v17 = vpack.c.bf16 %v354_v16, %v352_v15  ;;  %v593_v32 = vld [vmem:[#allocation6 + $0x88] sm:$0xff]  ;;  %v612_v49 = vld [vmem:[#allocation6 + $0x120] sm:$0xff] }
  0x70   :  { %1217 = vmatprep.subr.bf16.mxu0 %v1216_v18  ;;  %v357_v18 = vld [vmem:[#allocation4 + $0x208] sm:$0xff]  ;;  %v620_v55 = vld [vmem:[#allocation6 + $0x160] sm:$0xff] }
  0x71   :  { %v1260_v20 = vpack.c.bf16 %v359_v19, %v357_v18  ;;  %v597_v33 = vld [vmem:[#allocation6 + $0xa8] sm:$0xff]  ;;  %v628_v61 = vld [vmem:[#allocation6 + $0x1a0] sm:$0xff] }
  0x72   :  { %v601_v38 = vld [vmem:[#allocation6 + $0xc8] sm:$0xff]  ;;  %v636_v3 = vld [vmem:[#allocation6 + $0x1e0] sm:$0xff] }
  0x73   :  { %1219 = vmatpush1.bf16.msra.mxu0 %v1218_v23  ;;  %v576_v23 = vld [vmem:[#allocation6] sm:$0xff]  ;;  %v605_v39 = vld [vmem:[#allocation6 + $0xe8] sm:$0xff] }
  0x74   :  { %1221 = vmatprep.subr.bf16.mxu0 %v1220_v24  ;;  %v1324_v24 = vpack.c.bf16 %v581_v22, %v577_v21  ;;  %v1326_v28 = vpack.c.bf16 %v580_v25, %v576_v23  ;;  %v609_v44 = vld [vmem:[#allocation6 + $0x108] sm:$0xff]  ;;  %v644_v9 = vld [vmem:[#allocation6 + $0x220] sm:$0xff] }
  0x75   :  { %v613_v45 = vld [vmem:[#allocation6 + $0x128] sm:$0xff]  ;;  %v652_v15 = vld [vmem:[#allocation6 + $0x260] sm:$0xff] }
  0x76   :  { %1325 = vmatprep.subr.bf16.mxu1 %v1324_v24  ;;  %v617_v50 = vld [vmem:[#allocation6 + $0x148] sm:$0xff]  ;;  %v660_v21 = vld [vmem:[#allocation6 + $0x2a0] sm:$0xff] }
  0x77   :  { %1223 = vmatpush1.bf16.msra.mxu0 %v1222_v29  ;;  %v1328_v29 = vpack.c.bf16 %v589_v27, %v585_v26  ;;  %1327 = vmatpush1.bf16.msra.mxu1 %v1326_v28  ;;  %v621_v51 = vld [vmem:[#allocation6 + $0x168] sm:$0xff]  ;;  %v664_v26 = vld [vmem:[#allocation6 + $0x2c0] sm:$0xff]  ;;  %v122_v28 = vlaneseq }
  0x78   :  { %1225 = vmatprep.subr.bf16.mxu0 %v1224_v30  ;;  %v584_v30 = vld [vmem:[#allocation6 + $0x40] sm:$0xff]  ;;  %v625_v56 = vld [vmem:[#allocation6 + $0x188] sm:$0xff] }
  0x79   :  { %v1330_v34 = vpack.c.bf16 %v588_v31, %v584_v30  ;;  %1329 = vmatprep.subr.bf16.mxu1 %v1328_v29  ;;  %v629_v57 = vld [vmem:[#allocation6 + $0x1a8] sm:$0xff]  ;;  %v668_v27 = vld [vmem:[#allocation6 + $0x2e0] sm:$0xff] }
  0x7a   :  { %v633_v62 = vld [vmem:[#allocation6 + $0x1c8] sm:$0xff]  ;;  %v1370_v31 = vpack.c.bf16 %v668_v27, %v664_v26  ;;  %v372_v26 = vld [vmem:[#allocation4 + $0x280] sm:$0xff]  ;;  %v374_v27 = vld [vmem:[#allocation4 + $0x290] sm:$0xff] }
  0x7b   :  { %1227 = vmatpush1.bf16.msra.mxu0 %v1226_v35  ;;  %v1332_v35 = vpack.c.bf16 %v597_v33, %v593_v32  ;;  %1331 = vmatpush1.bf16.msra.mxu1 %v1330_v34  ;;  %v637_v63 = vld [vmem:[#allocation6 + $0x1e8] sm:$0xff]  ;;  %v672_v33 = vld [vmem:[#allocation6 + $0x300] sm:$0xff] }
  0x7c   :  { %1229 = vmatprep.subr.bf16.mxu0 %v1228_v36  ;;  %v592_v36 = vld [vmem:[#allocation6 + $0x80] sm:$0xff]  ;;  %v641_v4 = vld [vmem:[#allocation6 + $0x208] sm:$0xff] }
  0x7d   :  { %v1334_v40 = vpack.c.bf16 %v596_v37, %v592_v36  ;;  %1333 = vmatprep.subr.bf16.mxu1 %v1332_v35  ;;  %v645_v5 = vld [vmem:[#allocation6 + $0x228] sm:$0xff]  ;;  %v676_v34 = vld [vmem:[#allocation6 + $0x320] sm:$0xff]  ;;  %v1746_v35 = vshrl.u32 %v122_v28, 7 }
  0x7e   :  { %v649_v10 = vld [vmem:[#allocation6 + $0x248] sm:$0xff] }
  0x7f   :  { %1231 = vmatpush1.bf16.msra.mxu0 %v1230_v41  ;;  %v1336_v41 = vpack.c.bf16 %v605_v39, %v601_v38  ;;  %1335 = vmatpush1.bf16.msra.mxu1 %v1334_v40  ;;  %v657_v16 = vld [vmem:[#allocation6 + $0x288] sm:$0xff]  ;;  %v1374_v38 = vpack.c.bf16 %v676_v34, %v672_v33  ;;  %v680_v40 = vld [vmem:[#allocation6 + $0x340] sm:$0xff]  ;;  %v378_v33 = vld [vmem:[#allocation4 + $0x2b0] sm:$0xff] }
  0x80   :  { %1233 = vmatprep.subr.bf16.mxu0 %v1232_v42  ;;  %v600_v42 = vld [vmem:[#allocation6 + $0xc0] sm:$0xff]  ;;  %v665_v22 = vld [vmem:[#allocation6 + $0x2c8] sm:$0xff] }
  0x81   :  { %v1338_v46 = vpack.c.bf16 %v604_v43, %v600_v42  ;;  %1337 = vmatprep.subr.bf16.mxu1 %v1336_v41  ;;  %v669_v23 = vld [vmem:[#allocation6 + $0x2e8] sm:$0xff]  ;;  %v684_v41 = vld [vmem:[#allocation6 + $0x360] sm:$0xff]  ;;  %v1749_v42 = vsub.s32 0, %v1746_v35 }
  0x82   :  { %v1368_v25 = vpack.c.bf16 %v669_v23, %v665_v22  ;;  %v673_v29 = vld [vmem:[#allocation6 + $0x308] sm:$0xff]  ;;  %v375_v23 = vld [vmem:[#allocation4 + $0x298] sm:$0xff] }
  0x83   :  { %1235 = vmatpush1.bf16.msra.mxu0 %v1234_v47  ;;  %v1340_v47 = vpack.c.bf16 %v613_v45, %v609_v44  ;;  %1339 = vmatpush1.bf16.msra.mxu1 %v1338_v46  ;;  %v677_v30 = vld [vmem:[#allocation6 + $0x328] sm:$0xff]  ;;  %v1754_v45 = vld [vmem:[%s1803_s2] sm:$0xf]  ;;  %v1757_v46 = vsub.s32 1, %v1746_v35 }
  0x84   :  { %1237 = vmatprep.subr.bf16.mxu0 %v1236_v48  ;;  %v608_v48 = vld [vmem:[#allocation6 + $0x100] sm:$0xff]  ;;  %v1372_v32 = vpack.c.bf16 %v677_v30, %v673_v29  ;;  %v681_v36 = vld [vmem:[#allocation6 + $0x348] sm:$0xff]  ;;  %v379_v29 = vld [vmem:[#allocation4 + $0x2b8] sm:$0xff]  ;;  %v1278_v30 = vpack.c.bf16 %v374_v27, %v372_v26  ;;  %v132_v27 = vsub.s32 2, %v1746_v35 }
  0x85   :  { %v1342_v52 = vpack.c.bf16 %v612_v49, %v608_v48  ;;  %1341 = vmatprep.subr.bf16.mxu1 %v1340_v47  ;;  %v685_v37 = vld [vmem:[#allocation6 + $0x368] sm:$0xff]  ;;  %v1378_v47 = vpack.c.bf16 %v684_v41, %v680_v40  ;;  %v688_v49 = vld [vmem:[#allocation6 + $0x380] sm:$0xff]  ;;  %v382_v40 = vld [vmem:[#allocation4 + $0x2d0] sm:$0xff] }
  0x86   :  { %v1376_v39 = vpack.c.bf16 %v685_v37, %v681_v36  ;;  %v689_v43 = vld [vmem:[#allocation6 + $0x388] sm:$0xff]  ;;  %v383_v36 = vld [vmem:[#allocation4 + $0x2d8] sm:$0xff] }
  0x87   :  { %1239 = vmatpush1.bf16.msra.mxu0 %v1238_v53  ;;  %v1344_v53 = vpack.c.bf16 %v621_v51, %v617_v50  ;;  %1343 = vmatpush1.bf16.msra.mxu1 %v1342_v52  ;;  %v693_v44 = vld [vmem:[#allocation6 + $0x3a8] sm:$0xff]  ;;  %v692_v50 = vld [vmem:[#allocation6 + $0x3a0] sm:$0xff]  ;;  %v125_v51 = vrot.slane %v1754_v45, %v1749_v42  ;;  %v129_v52 = vrot.slane %v1754_v45, %v1757_v46 }
  0x88   :  { %1241 = vmatprep.subr.bf16.mxu0 %v1240_v54  ;;  %v616_v54 = vld [vmem:[#allocation6 + $0x140] sm:$0xff]  ;;  %v1380_v48 = vpack.c.bf16 %v693_v44, %v689_v43  ;;  %v373_v22 = vld [vmem:[#allocation4 + $0x288] sm:$0xff]  ;;  %v387_v43 = vld [vmem:[#allocation4 + $0x2f8] sm:$0xff] }
  0x89   :  { %v1346_v58 = vpack.c.bf16 %v620_v55, %v616_v54  ;;  %1345 = vmatprep.subr.bf16.mxu1 %v1344_v53  ;;  %v1382_v53 = vpack.c.bf16 %v692_v50, %v688_v49  ;;  %v136_v55 = vsub.s32 3, %v1746_v35  ;;  %v377_v28 = vld [vmem:[#allocation4 + $0x2a8] sm:$0xff]  ;;  %v386_v49 = vld [vmem:[#allocation4 + $0x2f0] sm:$0xff] }
  0x8a   :  { %v381_v34 = vld [vmem:[#allocation4 + $0x2c8] sm:$0xff] }
  0x8b   :  { %1243 = vmatpush1.bf16.msra.mxu0 %v1242_v59  ;;  %v1348_v59 = vpack.c.bf16 %v629_v57, %v625_v56  ;;  %1347 = vmatpush1.bf16.msra.mxu1 %v1346_v58  ;;  %v356_v58 = vld [vmem:[#allocation4 + $0x200] sm:$0xff]  ;;  %v385_v41 = vld [vmem:[#allocation4 + $0x2e8] sm:$0xff] }
  0x8c   :  { %1245 = vmatprep.subr.bf16.mxu0 %v1244_v60  ;;  %v624_v60 = vld [vmem:[#allocation6 + $0x180] sm:$0xff]  ;;  %v389_v50 = vld [vmem:[#allocation4 + $0x308] sm:$0xff] }
  0x8d   :  { %v1350_v0 = vpack.c.bf16 %v628_v61, %v624_v60  ;;  %1349 = vmatprep.subr.bf16.mxu1 %v1348_v59  ;;  %v358_v59 = vld [vmem:[#allocation4 + $0x210] sm:$0xff]  ;;  %v361_v61 = vld [vmem:[#allocation4 + $0x228] sm:$0xff] }
  0x8f   :  { %1247 = vmatpush1.bf16.msra.mxu0 %v1246_v1  ;;  %v1352_v1 = vpack.c.bf16 %v637_v63, %v633_v62  ;;  %1351 = vmatpush1.bf16.msra.mxu1 %v1350_v0  ;;  %v363_v62 = vld [vmem:[#allocation4 + $0x238] sm:$0xff]  ;;  %v1262_v0 = vpack.c.bf16 %v358_v59, %v356_v58 }
  0x90   :  { %1249 = vmatprep.subr.bf16.mxu0 %v1248_v2  ;;  %v632_v2 = vld [vmem:[#allocation6 + $0x1c0] sm:$0xff]  ;;  %v395_v58 = vld [vmem:[#allocation4 + $0x338] sm:$0xff] }
  0x91   :  { %v1354_v6 = vpack.c.bf16 %v636_v3, %v632_v2  ;;  %1353 = vmatprep.subr.bf16.mxu1 %v1352_v1  ;;  %v137_v1 = vrot.slane %v1754_v45, %v136_v55  ;;  %v1264_v3 = vpack.c.bf16 %v363_v62, %v361_v61  ;;  %v392_v61 = vld [vmem:[#allocation4 + $0x320] sm:$0xff]  ;;  %v394_v62 = vld [vmem:[#allocation4 + $0x330] sm:$0xff] }
  0x93   :  { %1251 = vmatpush1.bf16.msra.mxu0 %v1250_v7  ;;  %v1356_v7 = vpack.c.bf16 %v645_v5, %v641_v4  ;;  %1355 = vmatpush1.bf16.msra.mxu1 %v1354_v6  ;;  %v360_v4 = vld [vmem:[#allocation4 + $0x220] sm:$0xff]  ;;  %v362_v5 = vld [vmem:[#allocation4 + $0x230] sm:$0xff]  ;;  %v365_v6 = vld [vmem:[#allocation4 + $0x248] sm:$0xff] }
  0x94   :  { %1253 = vmatprep.subr.bf16.mxu0 %v1252_v8  ;;  %v640_v8 = vld [vmem:[#allocation6 + $0x200] sm:$0xff] }
  0x95   :  { %v1358_v12 = vpack.c.bf16 %v644_v9, %v640_v8  ;;  %1357 = vmatprep.subr.bf16.mxu1 %v1356_v7  ;;  %v367_v7 = vld [vmem:[#allocation4 + $0x258] sm:$0xff] }
  0x97   :  { %1255 = vmatpush1.bf16.msra.mxu0 %v1254_v11  ;;  %v653_v11 = vld [vmem:[#allocation6 + $0x268] sm:$0xff]  ;;  %1359 = vmatpush1.bf16.msra.mxu1 %v1358_v12  ;;  %v1268_v12 = vpack.c.bf16 %v367_v7, %v365_v6  ;;  %v403_v6 = vld [vmem:[#allocation4 + $0x378] sm:$0xff] }
  0x98   :  { %1257 = vmatprep.subr.bf16.mxu0 %v1256_v14  ;;  %v1360_v13 = vpack.c.bf16 %v653_v11, %v649_v10  ;;  %v648_v14 = vld [vmem:[#allocation6 + $0x240] sm:$0xff]  ;;  %v1266_v10 = vpack.c.bf16 %v362_v5, %v360_v4  ;;  %v398_v4 = vld [vmem:[#allocation4 + $0x350] sm:$0xff]  ;;  %v401_v5 = vld [vmem:[#allocation4 + $0x368] sm:$0xff] }
  0x99   :  { %v1362_v18 = vpack.c.bf16 %v652_v15, %v648_v14  ;;  %v366_v14 = vld [vmem:[#allocation4 + $0x250] sm:$0xff]  ;;  %v369_v15 = vld [vmem:[#allocation4 + $0x268] sm:$0xff] }
  0x9a   :  { %1361 = vmatprep.subr.bf16.mxu1 %v1360_v13  ;;  %v364_v13 = vld [vmem:[#allocation4 + $0x240] sm:$0xff] }
  0x9b   :  { %1259 = vmatpush1.bf16.msra.mxu0 %v1258_v17  ;;  %v661_v17 = vld [vmem:[#allocation6 + $0x2a8] sm:$0xff]  ;;  %1363 = vmatpush1.bf16.msra.mxu1 %v1362_v18  ;;  %v1270_v18 = vpack.c.bf16 %v366_v14, %v364_v13  ;;  %v407_v13 = vld [vmem:[#allocation4 + $0x398] sm:$0xff] }
  0x9c   :  { %1261 = vmatprep.subr.bf16.mxu0 %v1260_v20  ;;  %v1364_v19 = vpack.c.bf16 %v661_v17, %v657_v16  ;;  %v656_v20 = vld [vmem:[#allocation6 + $0x280] sm:$0xff]  ;;  %v371_v16 = vld [vmem:[#allocation4 + $0x278] sm:$0xff] }
  0x9d   :  { %v1366_v24 = vpack.c.bf16 %v660_v21, %v656_v20  ;;  %v368_v20 = vld [vmem:[#allocation4 + $0x260] sm:$0xff]  ;;  %v370_v21 = vld [vmem:[#allocation4 + $0x270] sm:$0xff] }
  0x9e   :  { %1365 = vmatprep.subr.bf16.mxu1 %v1364_v19  ;;  %v1272_v19 = vpack.c.bf16 %v371_v16, %v369_v15  ;;  %v404_v16 = vld [vmem:[#allocation4 + $0x380] sm:$0xff] }
  0x9f   :  { %1367 = vmatpush1.bf16.msra.mxu1 %v1366_v24  ;;  %v1274_v24 = vpack.c.bf16 %v370_v21, %v368_v20 }
  0xa0   :  { %1369 = vmatprep.subr.bf16.mxu1 %v1368_v25  ;;  %v1276_v25 = vpack.c.bf16 %v375_v23, %v373_v22  ;;  %v408_v22 = vld [vmem:[#allocation4 + $0x3a0] sm:$0xff]  ;;  %v410_v23 = vld [vmem:[#allocation4 + $0x3b0] sm:$0xff] }
  0xa1   :  { %v1314_v26 = vpack.c.bf16 %v410_v23, %v408_v22  ;;  %v882_v23 = vld [vmem:[#allocation7 + $0x50] sm:$0xff] }
  0xa3   :  { %1371 = vmatpush1.bf16.msra.mxu1 %v1370_v31  ;;  %v1280_v31 = vpack.c.bf16 %v379_v29, %v377_v28  ;;  %v412_v29 = vld [vmem:[#allocation4 + $0x3c0] sm:$0xff] }
  0xa4   :  { %1373 = vmatprep.subr.bf16.mxu1 %v1372_v32  ;;  %v376_v32 = vld [vmem:[#allocation4 + $0x2a0] sm:$0xff] }
  0xa5   :  { %v1282_v37 = vpack.c.bf16 %v378_v33, %v376_v32  ;;  %v419_v32 = vld [vmem:[#allocation4 + $0x3f8] sm:$0xff] }
  0xa7   :  { %1375 = vmatpush1.bf16.msra.mxu1 %v1374_v38  ;;  %v1284_v38 = vpack.c.bf16 %v383_v36, %v381_v34  ;;  %v133_v34 = vrot.slane %v1754_v45, %v132_v27  ;;  %v579_v45 = vld [vmem:[#allocation6 + $0x18] sm:$0xff] }
  0xa8   :  { %1377 = vmatprep.subr.bf16.mxu1 %v1376_v39  ;;  %v380_v39 = vld [vmem:[#allocation4 + $0x2c0] sm:$0xff] }
  0xa9   :  { %v1286_v44 = vpack.c.bf16 %v382_v40, %v380_v39 }
  0xab   :  { %1379 = vmatpush1.bf16.msra.mxu1 %v1378_v47  ;;  %v1288_v47 = vpack.c.bf16 %v387_v43, %v385_v41  ;;  %v697_v43 = vld [vmem:[#allocation6 + $0x3c8] sm:$0xff] }
  0xac   :  { %1381 = vmatprep.subr.bf16.mxu1 %v1380_v48  ;;  %v384_v48 = vld [vmem:[#allocation4 + $0x2e0] sm:$0xff] }
  0xaf   :  { %1383 = vmatpush1.bf16.msra.mxu1 %v1382_v53 }
 0x131   :  { %v212_v54 = vpop.f32.mrb[0].mxu0 }
 0x132   :  { %v213_v56 = vadd.f32 %v212_v54, %v125_v51  ;;  %v214_v57 = vpop.f32.mrb[1].mxu0  ;;  %v391_v51 = vld [vmem:[#allocation4 + $0x318] sm:$0xff]  ;;  %v388_v54 = vld [vmem:[#allocation4 + $0x300] sm:$0xff] }
 0x133   :  { %v215_v60 = vadd.f32 %v214_v57, %v129_v52  ;;  %v1767_v8 = vpop.f32.mrb[0].mxu1  ;;  %v1290_v52 = vpack.c.bf16 %v386_v49, %v384_v48  ;;  %v1292_v53 = vpack.c.bf16 %v391_v51, %v389_v50  ;;  %v393_v57 = vld [vmem:[#allocation4 + $0x328] sm:$0xff]  ;;  %v696_v48 = vld [vmem:[#allocation6 + $0x3c0] sm:$0xff]  ;;  %v583_v51 = vld [vmem:[#allocation6 + $0x38] sm:$0xff] }
 0x134   :  { %v288_v2 = vmax.f32 %v213_v56, 0.0  ;;  %v285_v9 = vpop.f32.mrb[1].mxu1  ;;  %v390_v56 = vld [vmem:[#allocation4 + $0x310] sm:$0xff]  ;;  %v284_v40 = vadd.f32 %v1767_v8, %v133_v34  ;;  %v700_v49 = vld [vmem:[#allocation6 + $0x3e0] sm:$0xff] }
 0x135   :  { %v289_v63 = vmax.f32 %v215_v60, 0.0  ;;  %v286_v11 = vadd.f32 %v285_v9, %v137_v1  ;;  %v1294_v59 = vpack.c.bf16 %v390_v56, %v388_v54  ;;  %v1296_v60 = vpack.c.bf16 %v395_v58, %v393_v57  ;;  %v889_v54 = vld [vmem:[#allocation7 + $0x88] sm:$0xff]  ;;  %v872_v56 = vld [vmem:[#allocation7] sm:$0xff]  ;;  %v890_v58 = vld [vmem:[#allocation7 + $0x90] sm:$0xff] }
 0x136   :  { %v1298_v1 = vpack.c.bf16 %v394_v62, %v392_v61  ;;  %v1304_v9 = vpack.c.bf16 %v403_v6, %v401_v5  ;;  %v290_v41 = vmax.f32 %v284_v40, 0.0  ;;  %v1386_v50 = vpack.c.bf16 %v700_v49, %v696_v48  ;;  %v873_v57 = vld [vmem:[#allocation7 + $0x8] sm:$0xff]  ;;  %v874_v62 = vld [vmem:[#allocation7 + $0x10] sm:$0xff]  ;;  %v587_v40 = vld [vmem:[#allocation6 + $0x58] sm:$0xff] }
 0x137   :  { %496 = vmatprep.mubr.f32.mxu0 %v289_v63  ;;  %v291_v17 = vmax.f32 %v286_v11, 0.0  ;;  %v397_v63 = vld [vmem:[#allocation4 + $0x348] sm:$0xff]  ;;  %v402_v11 = vld [vmem:[#allocation4 + $0x370] sm:$0xff] }
 0x138   :  { %497 = vmatmul.mubr.f32.vlgmr.msra.gmra.mrb[2].mxu0 %v288_v2  ;;  %v877_v5 = vld [vmem:[#allocation7 + $0x28] sm:$0xff]  ;;  %v894_v6 = vld [vmem:[#allocation7 + $0xb0] sm:$0xff] }
 0x139   :  { %1263 = vmatpush1.bf16.msra.mxu0 %v1262_v0  ;;  %567 = vmatprep.mubr.f32.mxu0 %v291_v17  ;;  %v399_v0 = vld [vmem:[#allocation4 + $0x358] sm:$0xff]  ;;  %v406_v17 = vld [vmem:[#allocation4 + $0x390] sm:$0xff] }
 0x13a   :  { %1265 = vmatprep.subr.bf16.mxu0 %v1264_v3  ;;  %v1300_v2 = vpack.c.bf16 %v399_v0, %v397_v63  ;;  %v396_v3 = vld [vmem:[#allocation4 + $0x340] sm:$0xff]  ;;  %v1310_v20 = vpack.c.bf16 %v406_v17, %v404_v16  ;;  %v875_v63 = vld [vmem:[#allocation7 + $0x18] sm:$0xff]  ;;  %v586_v49 = vld [vmem:[#allocation6 + $0x50] sm:$0xff] }
 0x13b   :  { %v1302_v7 = vpack.c.bf16 %v398_v4, %v396_v3  ;;  %v892_v0 = vld [vmem:[#allocation7 + $0xa0] sm:$0xff] }
 0x13c   :  { %v876_v4 = vld [vmem:[#allocation7 + $0x20] sm:$0xff] }
 0x13d   :  { %1267 = vmatpush1.bf16.msra.mxu0 %v1266_v10  ;;  %v400_v10 = vld [vmem:[#allocation4 + $0x360] sm:$0xff] }
 0x13e   :  { %1269 = vmatprep.subr.bf16.mxu0 %v1268_v12  ;;  %v405_v12 = vld [vmem:[#allocation4 + $0x388] sm:$0xff]  ;;  %v1306_v14 = vpack.c.bf16 %v402_v11, %v400_v10  ;;  %v878_v11 = vld [vmem:[#allocation7 + $0x30] sm:$0xff]  ;;  %v880_v17 = vld [vmem:[#allocation7 + $0x40] sm:$0xff] }
 0x13f   :  { %v1308_v15 = vpack.c.bf16 %v407_v13, %v405_v12  ;;  %v879_v12 = vld [vmem:[#allocation7 + $0x38] sm:$0xff]  ;;  %v896_v13 = vld [vmem:[#allocation7 + $0xc0] sm:$0xff] }
 0x141   :  { %1271 = vmatpush1.bf16.msra.mxu0 %v1270_v18  ;;  %v409_v18 = vld [vmem:[#allocation4 + $0x3a8] sm:$0xff] }
 0x142   :  { %1273 = vmatprep.subr.bf16.mxu0 %v1272_v19  ;;  %v411_v19 = vld [vmem:[#allocation4 + $0x3b8] sm:$0xff] }
 0x143   :  { %v1312_v21 = vpack.c.bf16 %v411_v19, %v409_v18  ;;  %v881_v18 = vld [vmem:[#allocation7 + $0x48] sm:$0xff]  ;;  %v898_v19 = vld [vmem:[#allocation7 + $0xd0] sm:$0xff] }
 0x145   :  { %1275 = vmatpush1.bf16.msra.mxu0 %v1274_v24  ;;  %v413_v24 = vld [vmem:[#allocation4 + $0x3c8] sm:$0xff] }
 0x146   :  { %1277 = vmatprep.subr.bf16.mxu0 %v1276_v25  ;;  %v415_v25 = vld [vmem:[#allocation4 + $0x3d8] sm:$0xff] }
 0x147   :  { %v1316_v28 = vpack.c.bf16 %v415_v25, %v413_v24  ;;  %v883_v24 = vld [vmem:[#allocation7 + $0x58] sm:$0xff]  ;;  %v900_v25 = vld [vmem:[#allocation7 + $0xe0] sm:$0xff] }
 0x149   :  { %1279 = vmatpush1.bf16.msra.mxu0 %v1278_v30  ;;  %v414_v30 = vld [vmem:[#allocation4 + $0x3d0] sm:$0xff] }
 0x14a   :  { %1281 = vmatprep.subr.bf16.mxu0 %v1280_v31  ;;  %v417_v31 = vld [vmem:[#allocation4 + $0x3e8] sm:$0xff]  ;;  %v1318_v33 = vpack.c.bf16 %v414_v30, %v412_v29  ;;  %v420_v30 = vld [vmem:[%s1805_s4] sm:$0x3] }
 0x14b   :  { %v1320_v36 = vpack.c.bf16 %v419_v32, %v417_v31  ;;  %v425_v31 = vrot.slane %v420_v30, %v1749_v42  ;;  %v429_v32 = vrot.slane %v420_v30, %v1757_v46  ;;  %v651_v30 = vld [vmem:[#allocation6 + $0x258] sm:$0xff] }
 0x14d   :  { %1283 = vmatpush1.bf16.msra.mxu0 %v1282_v37  ;;  %v416_v37 = vld [vmem:[#allocation4 + $0x3e0] sm:$0xff] }
 0x14e   :  { %1285 = vmatprep.subr.bf16.mxu0 %v1284_v38  ;;  %v418_v38 = vld [vmem:[#allocation4 + $0x3f0] sm:$0xff] }
 0x14f   :  { %v1322_v39 = vpack.c.bf16 %v418_v38, %v416_v37  ;;  %v578_v37 = vld [vmem:[#allocation6 + $0x10] sm:$0xff] }
 0x150   :  { %v582_v38 = vld [vmem:[#allocation6 + $0x30] sm:$0xff] }
 0x151   :  { %1287 = vmatpush1.bf16.msra.mxu0 %v1286_v44  ;;  %v701_v44 = vld [vmem:[#allocation6 + $0x3e8] sm:$0xff] }
 0x152   :  { %1289 = vmatprep.subr.bf16.mxu0 %v1288_v47  ;;  %v1384_v47 = vpack.c.bf16 %v701_v44, %v697_v43  ;;  %v1390_v44 = vpack.c.bf16 %v582_v38, %v578_v37  ;;  %v654_v37 = vld [vmem:[#allocation6 + $0x270] sm:$0xff]  ;;  %v659_v38 = vld [vmem:[#allocation6 + $0x298] sm:$0xff] }
 0x154   :  { %1385 = vmatprep.subr.bf16.mxu1 %v1384_v47 }
 0x155   :  { %1291 = vmatpush1.bf16.msra.mxu0 %v1290_v52  ;;  %1387 = vmatpush1.bf16.msra.mxu1 %v1386_v50  ;;  %v1388_v52 = vpack.c.bf16 %v583_v51, %v579_v45  ;;  %v590_v50 = vld [vmem:[#allocation6 + $0x70] sm:$0xff]  ;;  %v595_v45 = vld [vmem:[#allocation6 + $0x98] sm:$0xff] }
 0x156   :  { %1293 = vmatprep.subr.bf16.mxu0 %v1292_v53  ;;  %v888_v53 = vld [vmem:[#allocation7 + $0x80] sm:$0xff]  ;;  %v599_v51 = vld [vmem:[#allocation6 + $0xb8] sm:$0xff] }
 0x157   :  { %1389 = vmatprep.subr.bf16.mxu1 %v1388_v52  ;;  %v1452_v8 = vpack.c.bf16 %v889_v54, %v888_v53  ;;  %v1394_v52 = vpack.c.bf16 %v590_v50, %v586_v49  ;;  %v1396_v53 = vpack.c.bf16 %v599_v51, %v595_v45  ;;  %v594_v54 = vld [vmem:[#allocation6 + $0x90] sm:$0xff]  ;;  %v671_v49 = vld [vmem:[#allocation6 + $0x2f8] sm:$0xff] }
 0x158   :  { %v666_v51 = vld [vmem:[#allocation6 + $0x2d0] sm:$0xff] }
 0x159   :  { %1295 = vmatpush1.bf16.msra.mxu0 %v1294_v59  ;;  %v891_v59 = vld [vmem:[#allocation7 + $0x98] sm:$0xff] }
 0x15a   :  { %1297 = vmatprep.subr.bf16.mxu0 %v1296_v60  ;;  %v1454_v60 = vpack.c.bf16 %v873_v57, %v872_v56  ;;  %v1456_v61 = vpack.c.bf16 %v891_v59, %v890_v58  ;;  %v598_v56 = vld [vmem:[#allocation6 + $0xb0] sm:$0xff]  ;;  %v607_v57 = vld [vmem:[#allocation6 + $0xf8] sm:$0xff] }
 0x15b   :  { %v1398_v58 = vpack.c.bf16 %v598_v56, %v594_v54  ;;  %v679_v54 = vld [vmem:[#allocation6 + $0x338] sm:$0xff] }
 0x15d   :  { %1299 = vmatpush1.bf16.msra.mxu0 %v1298_v1  ;;  %v893_v1 = vld [vmem:[#allocation7 + $0xa8] sm:$0xff] }
 0x15e   :  { %1301 = vmatprep.subr.bf16.mxu0 %v1300_v2  ;;  %v1458_v2 = vpack.c.bf16 %v875_v63, %v874_v62  ;;  %v1460_v3 = vpack.c.bf16 %v893_v1, %v892_v0  ;;  %v611_v62 = vld [vmem:[#allocation6 + $0x118] sm:$0xff] }
 0x15f   :  { %v615_v63 = vld [vmem:[#allocation6 + $0x138] sm:$0xff] }
 0x160   :  { %v1404_v1 = vpack.c.bf16 %v615_v63, %v611_v62  ;;  %v682_v63 = vld [vmem:[#allocation6 + $0x350] sm:$0xff] }
 0x161   :  { %1303 = vmatpush1.bf16.msra.mxu0 %v1302_v7  ;;  %v895_v7 = vld [vmem:[#allocation7 + $0xb8] sm:$0xff] }
 0x162   :  { %1305 = vmatprep.subr.bf16.mxu0 %v1304_v9  ;;  %v1462_v9 = vpack.c.bf16 %v877_v5, %v876_v4  ;;  %v1464_v10 = vpack.c.bf16 %v895_v7, %v894_v6  ;;  %v619_v4 = vld [vmem:[#allocation6 + $0x158] sm:$0xff] }
 0x163   :  { %v623_v5 = vld [vmem:[#allocation6 + $0x178] sm:$0xff] }
 0x164   :  { %v1408_v7 = vpack.c.bf16 %v623_v5, %v619_v4  ;;  %v690_v5 = vld [vmem:[#allocation6 + $0x390] sm:$0xff] }
 0x165   :  { %1307 = vmatpush1.bf16.msra.mxu0 %v1306_v14  ;;  %v897_v14 = vld [vmem:[#allocation7 + $0xc8] sm:$0xff] }
 0x166   :  { %1309 = vmatprep.subr.bf16.mxu0 %v1308_v15  ;;  %v1466_v15 = vpack.c.bf16 %v879_v12, %v878_v11  ;;  %v1468_v16 = vpack.c.bf16 %v897_v14, %v896_v13  ;;  %v627_v11 = vld [vmem:[#allocation6 + $0x198] sm:$0xff] }
 0x167   :  { %v631_v12 = vld [vmem:[#allocation6 + $0x1b8] sm:$0xff] }
 0x168   :  { %v1412_v14 = vpack.c.bf16 %v631_v12, %v627_v11  ;;  %v698_v12 = vld [vmem:[#allocation6 + $0x3d0] sm:$0xff] }
 0x169   :  { %1311 = vmatpush1.bf16.msra.mxu0 %v1310_v20  ;;  %v899_v20 = vld [vmem:[#allocation7 + $0xd8] sm:$0xff] }
 0x16a   :  { %1313 = vmatprep.subr.bf16.mxu0 %v1312_v21  ;;  %v1470_v21 = vpack.c.bf16 %v881_v18, %v880_v17  ;;  %v1472_v22 = vpack.c.bf16 %v899_v20, %v898_v19  ;;  %v635_v17 = vld [vmem:[#allocation6 + $0x1d8] sm:$0xff] }
 0x16b   :  { %v639_v18 = vld [vmem:[#allocation6 + $0x1f8] sm:$0xff] }
 0x16c   :  { %v1416_v20 = vpack.c.bf16 %v639_v18, %v635_v17  ;;  %v902_v18 = vld [vmem:[#allocation7 + $0xf0] sm:$0xff] }
 0x16d   :  { %1315 = vmatpush1.bf16.msra.mxu0 %v1314_v26  ;;  %v901_v26 = vld [vmem:[#allocation7 + $0xe8] sm:$0xff] }
 0x16e   :  { %1317 = vmatprep.subr.bf16.mxu0 %v1316_v28  ;;  %v1474_v28 = vpack.c.bf16 %v883_v24, %v882_v23  ;;  %v1476_v29 = vpack.c.bf16 %v901_v26, %v900_v25  ;;  %v643_v23 = vld [vmem:[#allocation6 + $0x218] sm:$0xff] }
 0x16f   :  { %v647_v24 = vld [vmem:[#allocation6 + $0x238] sm:$0xff] }
 0x170   :  { %v1420_v26 = vpack.c.bf16 %v647_v24, %v643_v23  ;;  %v920_v24 = vld [vmem:[#allocation7 + $0x180] sm:$0xff] }
 0x171   :  { %1319 = vmatpush1.bf16.msra.mxu0 %v1318_v33 }
 0x172   :  { %1321 = vmatprep.subr.bf16.mxu0 %v1320_v36 }
 0x175   :  { %1323 = vmatpush1.bf16.msra.mxu0 %v1322_v39 }
 0x176   :  { %1453 = vmatprep.subr.bf16.mxu0 %v1452_v8  ;;  %v603_v8 = vld [vmem:[#allocation6 + $0xd8] sm:$0xff] }
 0x177   :  { %v1400_v59 = vpack.c.bf16 %v607_v57, %v603_v8  ;;  %v674_v57 = vld [vmem:[#allocation6 + $0x310] sm:$0xff] }
 0x178   :  { %568 = vmatmul.mubr.f32.vlgmr.msra.gmra.mrb[2].mxu0 %v290_v41  ;;  %v591_v41 = vld [vmem:[#allocation6 + $0x78] sm:$0xff] }
 0x179   :  { %1455 = vmatpush3.bf16.msra.mxu0 %v1454_v60  ;;  %v1392_v48 = vpack.c.bf16 %v591_v41, %v587_v40  ;;  %v602_v60 = vld [vmem:[#allocation6 + $0xd0] sm:$0xff] }
 0x17a   :  { %1457 = vmatprep.subr.bf16.mxu0 %v1456_v61  ;;  %v606_v61 = vld [vmem:[#allocation6 + $0xf0] sm:$0xff] }
 0x17b   :  { %v1402_v0 = vpack.c.bf16 %v606_v61, %v602_v60  ;;  %v687_v60 = vld [vmem:[#allocation6 + $0x378] sm:$0xff] }
 0x17d   :  { %1459 = vmatpush3.bf16.msra.mxu0 %v1458_v2  ;;  %v610_v2 = vld [vmem:[#allocation6 + $0x110] sm:$0xff] }
 0x17e   :  { %1461 = vmatprep.subr.bf16.mxu0 %v1460_v3  ;;  %v614_v3 = vld [vmem:[#allocation6 + $0x130] sm:$0xff] }
 0x17f   :  { %v1406_v6 = vpack.c.bf16 %v614_v3, %v610_v2  ;;  %v695_v2 = vld [vmem:[#allocation6 + $0x3b8] sm:$0xff] }
 0x181   :  { %1463 = vmatpush3.bf16.msra.mxu0 %v1462_v9  ;;  %v618_v9 = vld [vmem:[#allocation6 + $0x150] sm:$0xff] }
 0x182   :  { %1465 = vmatprep.subr.bf16.mxu0 %v1464_v10  ;;  %v622_v10 = vld [vmem:[#allocation6 + $0x170] sm:$0xff] }
 0x183   :  { %v1410_v13 = vpack.c.bf16 %v622_v10, %v618_v9  ;;  %v703_v9 = vld [vmem:[#allocation6 + $0x3f8] sm:$0xff] }
 0x185   :  { %1467 = vmatpush3.bf16.msra.mxu0 %v1466_v15  ;;  %v626_v15 = vld [vmem:[#allocation6 + $0x190] sm:$0xff] }
 0x186   :  { %1469 = vmatprep.subr.bf16.mxu0 %v1468_v16  ;;  %v630_v16 = vld [vmem:[#allocation6 + $0x1b0] sm:$0xff] }
 0x187   :  { %v1414_v19 = vpack.c.bf16 %v630_v16, %v626_v15  ;;  %v884_v15 = vld [vmem:[#allocation7 + $0x60] sm:$0xff]  ;;  %v885_v16 = vld [vmem:[#allocation7 + $0x68] sm:$0xff] }
 0x188   :  { %v1478_v17 = vpack.c.bf16 %v885_v16, %v884_v15 }
 0x189   :  { %1471 = vmatpush3.bf16.msra.mxu0 %v1470_v21  ;;  %v634_v21 = vld [vmem:[#allocation6 + $0x1d0] sm:$0xff] }
 0x18a   :  { %1473 = vmatprep.subr.bf16.mxu0 %v1472_v22  ;;  %v638_v22 = vld [vmem:[#allocation6 + $0x1f0] sm:$0xff] }
 0x18b   :  { %v1418_v25 = vpack.c.bf16 %v638_v22, %v634_v21  ;;  %v886_v21 = vld [vmem:[#allocation7 + $0x70] sm:$0xff]  ;;  %v887_v22 = vld [vmem:[#allocation7 + $0x78] sm:$0xff] }
 0x18c   :  { %v1482_v23 = vpack.c.bf16 %v887_v22, %v886_v21 }
 0x18d   :  { %1475 = vmatpush3.bf16.msra.mxu0 %v1474_v28  ;;  %v642_v28 = vld [vmem:[#allocation6 + $0x210] sm:$0xff] }
 0x18e   :  { %1477 = vmatprep.subr.bf16.mxu0 %v1476_v29  ;;  %v646_v29 = vld [vmem:[#allocation6 + $0x230] sm:$0xff] }
 0x191   :  { %1479 = vmatpush3.bf16.msra.mxu0 %v1478_v17 }
 0x24b   :  { %v569_v33 = vpop.f32.mrb[2].mxu0 }
 0x24c   :  { %v1779_v34 = vadd.f32 %v569_v33, %v425_v31  ;;  %v571_v36 = vpop.f32.mrb[3].mxu0  ;;  %v655_v31 = vld [vmem:[#allocation6 + $0x278] sm:$0xff] }
 0x24d   :  { %v1517_v39 = vadd.f32 %v571_v36, %v429_v32  ;;  %v1422_v32 = vpack.c.bf16 %v646_v29, %v642_v28  ;;  %v1424_v33 = vpack.c.bf16 %v655_v31, %v651_v30  ;;  %v650_v36 = vld [vmem:[#allocation6 + $0x250] sm:$0xff]  ;;  %v905_v29 = vld [vmem:[#allocation7 + $0x108] sm:$0xff] }
 0x24e   :  { %v574_v47 = vmax.f32 %v1779_v34, 0.0  ;;  %v1426_v40 = vpack.c.bf16 %v654_v37, %v650_v36  ;;  %v922_v30 = vld [vmem:[#allocation7 + $0x190] sm:$0xff]  ;;  %v923_v34 = vld [vmem:[#allocation7 + $0x198] sm:$0xff]  ;;  %v924_v36 = vld [vmem:[#allocation7 + $0x1a0] sm:$0xff] }
 0x24f   :  { %v575_v43 = vmax.f32 %v1517_v39, 0.0  ;;  %v663_v39 = vld [vmem:[#allocation6 + $0x2b8] sm:$0xff]  ;;  %v1488_v31 = vpack.c.bf16 %v923_v34, %v922_v30  ;;  %v925_v37 = vld [vmem:[#allocation7 + $0x1a8] sm:$0xff] }
 0x250   :  { %v1428_v41 = vpack.c.bf16 %v663_v39, %v659_v38  ;;  %v1492_v39 = vpack.c.bf16 %v925_v37, %v924_v36 }
 0x251   :  { %790 = vmatprep.mubr.f32.mxu1 %v575_v43 }
 0x252   :  { %791 = vmatmul.mubr.f32.vlgmr.msra.gmra.mrb[2].mxu1 %v574_v47 }
 0x253   :  { %1391 = vmatpush1.bf16.msra.mxu1 %v1390_v44  ;;  %861 = vmatprep.mubr.f32.mxu1 %v575_v43  ;;  %v658_v43 = vld [vmem:[#allocation6 + $0x290] sm:$0xff] }
 0x254   :  { %1393 = vmatprep.subr.bf16.mxu1 %v1392_v48  ;;  %v662_v44 = vld [vmem:[#allocation6 + $0x2b0] sm:$0xff]  ;;  %v667_v48 = vld [vmem:[#allocation6 + $0x2d8] sm:$0xff] }
 0x255   :  { %v1430_v50 = vpack.c.bf16 %v662_v44, %v658_v43  ;;  %v1432_v45 = vpack.c.bf16 %v671_v49, %v667_v48  ;;  %v926_v43 = vld [vmem:[#allocation7 + $0x1b0] sm:$0xff]  ;;  %v927_v44 = vld [vmem:[#allocation7 + $0x1b8] sm:$0xff] }
 0x256   :  { %v1496_v49 = vpack.c.bf16 %v927_v44, %v926_v43 }
 0x257   :  { %1395 = vmatpush1.bf16.msra.mxu1 %v1394_v52  ;;  %v670_v52 = vld [vmem:[#allocation6 + $0x2f0] sm:$0xff] }
 0x258   :  { %1397 = vmatprep.subr.bf16.mxu1 %v1396_v53  ;;  %v675_v53 = vld [vmem:[#allocation6 + $0x318] sm:$0xff]  ;;  %v1434_v56 = vpack.c.bf16 %v670_v52, %v666_v51  ;;  %v928_v51 = vld [vmem:[#allocation7 + $0x1c0] sm:$0xff]  ;;  %v929_v52 = vld [vmem:[#allocation7 + $0x1c8] sm:$0xff] }
 0x259   :  { %v1436_v8 = vpack.c.bf16 %v679_v54, %v675_v53  ;;  %v1500_v54 = vpack.c.bf16 %v929_v52, %v928_v51 }
 0x25b   :  { %1399 = vmatpush1.bf16.msra.mxu1 %v1398_v58  ;;  %v678_v58 = vld [vmem:[#allocation6 + $0x330] sm:$0xff] }
 0x25c   :  { %1401 = vmatprep.subr.bf16.mxu1 %v1400_v59  ;;  %v683_v59 = vld [vmem:[#allocation6 + $0x358] sm:$0xff]  ;;  %v1438_v61 = vpack.c.bf16 %v678_v58, %v674_v57  ;;  %v930_v57 = vld [vmem:[#allocation7 + $0x1d0] sm:$0xff] }
 0x25d   :  { %v1440_v62 = vpack.c.bf16 %v687_v60, %v683_v59  ;;  %v931_v58 = vld [vmem:[#allocation7 + $0x1d8] sm:$0xff] }
 0x25e   :  { %v1504_v60 = vpack.c.bf16 %v931_v58, %v930_v57 }
 0x25f   :  { %1403 = vmatpush1.bf16.msra.mxu1 %v1402_v0  ;;  %v686_v0 = vld [vmem:[#allocation6 + $0x370] sm:$0xff] }
 0x260   :  { %1405 = vmatprep.subr.bf16.mxu1 %v1404_v1  ;;  %v691_v1 = vld [vmem:[#allocation6 + $0x398] sm:$0xff]  ;;  %v1442_v3 = vpack.c.bf16 %v686_v0, %v682_v63  ;;  %v932_v63 = vld [vmem:[#allocation7 + $0x1e0] sm:$0xff]  ;;  %v933_v0 = vld [vmem:[#allocation7 + $0x1e8] sm:$0xff] }
 0x261   :  { %v1444_v4 = vpack.c.bf16 %v695_v2, %v691_v1  ;;  %v1508_v2 = vpack.c.bf16 %v933_v0, %v932_v63 }
 0x263   :  { %1407 = vmatpush1.bf16.msra.mxu1 %v1406_v6  ;;  %v694_v6 = vld [vmem:[#allocation6 + $0x3b0] sm:$0xff] }
 0x264   :  { %1409 = vmatprep.subr.bf16.mxu1 %v1408_v7  ;;  %v699_v7 = vld [vmem:[#allocation6 + $0x3d8] sm:$0xff]  ;;  %v1446_v10 = vpack.c.bf16 %v694_v6, %v690_v5  ;;  %v934_v6 = vld [vmem:[#allocation7 + $0x1f0] sm:$0xff] }
 0x265   :  { %v1448_v11 = vpack.c.bf16 %v703_v9, %v699_v7  ;;  %v935_v7 = vld [vmem:[#allocation7 + $0x1f8] sm:$0xff] }
 0x266   :  { %v1512_v9 = vpack.c.bf16 %v935_v7, %v934_v6 }
 0x267   :  { %1411 = vmatpush1.bf16.msra.mxu1 %v1410_v13  ;;  %v702_v13 = vld [vmem:[#allocation6 + $0x3f0] sm:$0xff] }
 0x268   :  { %1413 = vmatprep.subr.bf16.mxu1 %v1412_v14  ;;  %v1450_v14 = vpack.c.bf16 %v702_v13, %v698_v12  ;;  %v704_v13 = vld [vmem:[%s1807_s6] sm:$0xf] }
 0x269   :  { %v713_v15 = vrot.slane %v704_v13, %v1757_v46  ;;  %v717_v22 = vrot.slane %v704_v13, %v132_v27 }
 0x26b   :  { %1415 = vmatpush1.bf16.msra.mxu1 %v1414_v19  ;;  %v903_v19 = vld [vmem:[#allocation7 + $0xf8] sm:$0xff] }
 0x26c   :  { %1417 = vmatprep.subr.bf16.mxu1 %v1416_v20  ;;  %v1480_v20 = vpack.c.bf16 %v903_v19, %v902_v18 }
 0x26e   :  { %1481 = vmatprep.subr.bf16.mxu0 %v1480_v20 }
 0x26f   :  { %1419 = vmatpush1.bf16.msra.mxu1 %v1418_v25  ;;  %1483 = vmatpush3.bf16.msra.mxu0 %v1482_v23  ;;  %v921_v25 = vld [vmem:[#allocation7 + $0x188] sm:$0xff]  ;;  %v721_v23 = vrot.slane %v704_v13, %v136_v55 }
 0x270   :  { %1421 = vmatprep.subr.bf16.mxu1 %v1420_v26  ;;  %v904_v26 = vld [vmem:[#allocation7 + $0x100] sm:$0xff]  ;;  %v1484_v28 = vpack.c.bf16 %v921_v25, %v920_v24 }
 0x273   :  { %1423 = vmatpush1.bf16.msra.mxu1 %v1422_v32  ;;  %v906_v32 = vld [vmem:[#allocation7 + $0x110] sm:$0xff] }
 0x274   :  { %1425 = vmatprep.subr.bf16.mxu1 %v1424_v33  ;;  %v907_v33 = vld [vmem:[#allocation7 + $0x118] sm:$0xff] }
 0x275   :  { %v1490_v38 = vpack.c.bf16 %v907_v33, %v906_v32 }
 0x277   :  { %1427 = vmatpush1.bf16.msra.mxu1 %v1426_v40  ;;  %v908_v40 = vld [vmem:[#allocation7 + $0x120] sm:$0xff] }
 0x278   :  { %1429 = vmatprep.subr.bf16.mxu1 %v1428_v41  ;;  %v909_v41 = vld [vmem:[#allocation7 + $0x128] sm:$0xff] }
 0x279   :  { %v1494_v48 = vpack.c.bf16 %v909_v41, %v908_v40 }
 0x27b   :  { %1431 = vmatpush1.bf16.msra.mxu1 %v1430_v50  ;;  %v910_v50 = vld [vmem:[#allocation7 + $0x130] sm:$0xff] }
 0x27c   :  { %1433 = vmatprep.subr.bf16.mxu1 %v1432_v45  ;;  %v911_v45 = vld [vmem:[#allocation7 + $0x138] sm:$0xff] }
 0x27d   :  { %v1498_v53 = vpack.c.bf16 %v911_v45, %v910_v50 }
 0x27f   :  { %1435 = vmatpush1.bf16.msra.mxu1 %v1434_v56  ;;  %v912_v56 = vld [vmem:[#allocation7 + $0x140] sm:$0xff] }
 0x280   :  { %1437 = vmatprep.subr.bf16.mxu1 %v1436_v8  ;;  %v913_v8 = vld [vmem:[#allocation7 + $0x148] sm:$0xff] }
 0x281   :  { %v1502_v59 = vpack.c.bf16 %v913_v8, %v912_v56 }
 0x283   :  { %1439 = vmatpush1.bf16.msra.mxu1 %v1438_v61  ;;  %v914_v61 = vld [vmem:[#allocation7 + $0x150] sm:$0xff] }
 0x284   :  { %1441 = vmatprep.subr.bf16.mxu1 %v1440_v62  ;;  %v915_v62 = vld [vmem:[#allocation7 + $0x158] sm:$0xff] }
 0x285   :  { %v1506_v1 = vpack.c.bf16 %v915_v62, %v914_v61 }
 0x287   :  { %1443 = vmatpush1.bf16.msra.mxu1 %v1442_v3  ;;  %v916_v3 = vld [vmem:[#allocation7 + $0x160] sm:$0xff] }
 0x288   :  { %1445 = vmatprep.subr.bf16.mxu1 %v1444_v4  ;;  %v917_v4 = vld [vmem:[#allocation7 + $0x168] sm:$0xff] }
 0x289   :  { %v1510_v5 = vpack.c.bf16 %v917_v4, %v916_v3 }
 0x28b   :  { %1447 = vmatpush1.bf16.msra.mxu1 %v1446_v10  ;;  %v918_v10 = vld [vmem:[#allocation7 + $0x170] sm:$0xff] }
 0x28c   :  { %1449 = vmatprep.subr.bf16.mxu1 %v1448_v11  ;;  %v919_v11 = vld [vmem:[#allocation7 + $0x178] sm:$0xff] }
 0x28d   :  { %v1514_v12 = vpack.c.bf16 %v919_v11, %v918_v10 }
 0x28f   :  { %1451 = vmatpush1.bf16.msra.mxu1 %v1450_v14  ;;  %v709_v14 = vrot.slane %v704_v13, %v1749_v42 }
 0x290   :  { %1485 = vmatprep.subr.bf16.mxu1 %v1484_v28 }
 0x292   :  { %862 = vmatmul.mubr.f32.vlgmr.msra.gmra.mrb[4].mxu1 %v574_v47  ;;  %v1486_v47 = vpack.c.bf16 %v905_v29, %v904_v26 }
 0x294   :  { %1487 = vmatpush3.bf16.msra.mxu1 %v1486_v47  ;;  %v1093_v47 = vld [vmem:[%s1809_s8] ss:$0 sm:$0xff] }
 0x295   :  { %1489 = vmatprep.subr.bf16.mxu1 %v1488_v31 }
 0x298   :  { %1491 = vmatpush3.bf16.msra.mxu1 %v1490_v38 }
 0x299   :  { %1493 = vmatprep.subr.bf16.mxu1 %v1492_v39 }
 0x29c   :  { %1495 = vmatpush3.bf16.msra.mxu1 %v1494_v48 }
 0x29d   :  { %1497 = vmatprep.subr.bf16.mxu1 %v1496_v49 }
 0x2a0   :  { %1499 = vmatpush3.bf16.msra.mxu1 %v1498_v53 }
 0x2a1   :  { %1501 = vmatprep.subr.bf16.mxu1 %v1500_v54 }
 0x2a4   :  { %1503 = vmatpush3.bf16.msra.mxu1 %v1502_v59 }
 0x2a5   :  { %1505 = vmatprep.subr.bf16.mxu1 %v1504_v60 }
 0x2a8   :  { %1507 = vmatpush3.bf16.msra.mxu1 %v1506_v1 }
 0x2a9   :  { %1509 = vmatprep.subr.bf16.mxu1 %v1508_v2 }
 0x2ac   :  { %1511 = vmatpush3.bf16.msra.mxu1 %v1510_v5 }
 0x2ad   :  { %1513 = vmatprep.subr.bf16.mxu1 %v1512_v9 }
 0x2b0   :  { %1515 = vmatpush3.bf16.msra.mxu1 %v1514_v12 }
 0x325   :  { %v792_v16 = vpop.f32.mrb[2].mxu1 }
 0x326   :  { %v793_v17 = vadd.f32 %v792_v16, %v709_v14  ;;  %v794_v18 = vpop.f32.mrb[3].mxu1 }
 0x327   :  { %v795_v19 = vadd.f32 %v794_v18, %v713_v15 }
 0x328   :  { %v868_v21 = vmax.f32 %v793_v17, 0.0 }
 0x329   :  { %v869_v20 = vmax.f32 %v795_v19, 0.0 }
 0x32b   :  { %1007 = vmatprep.mubr.f32.mxu0 %v869_v20 }
 0x32c   :  { %1008 = vmatmul.mubr.f32.vlgmr.msra.gmra.mrb[4].mxu0 %v868_v21 }
 0x365   :  { %v863_v24 = vpop.f32.mrb[4].mxu1 }
 0x366   :  { %v864_v25 = vadd.f32 %v863_v24, %v717_v22  ;;  %v865_v26 = vpop.f32.mrb[5].mxu1 }
 0x367   :  { %v866_v42 = vadd.f32 %v865_v26, %v721_v23 }
 0x368   :  { %v870_v46 = vmax.f32 %v864_v25, 0.0 }
 0x369   :  { %v871_v28 = vmax.f32 %v866_v42, 0.0 }
 0x36b   :  { %1077 = vmatprep.mubr.f32.mxu1 %v871_v28 }
 0x36c   :  { %1078 = vmatmul.mubr.f32.vlgmr.msra.gmra.mrb[6].mxu1 %v870_v46 }
 0x3ff   :  { %v1126_v29 = vpop.f32.mrb[4].mxu0 }
 0x400   :  { %v1127_v30 = vpop.f32.mrb[5].mxu0 }
 0x401   :  { %v1128_v34 = vadd.f32 %v1127_v30, %v1126_v29 }
 0x403   :  { %v1010_v32 = vadd.f32 %v1128_v34, %v1093_v47 }
 0x43f   :  { %v1161_v31 = vpop.f32.mrb[6].mxu1 }
 0x440   :  { %v1162_v27 = vpop.f32.mrb[7].mxu1 }
 0x441   :  { %v1163_v35 = vadd.f32 %v1162_v27, %v1161_v31 }
 0x443   :  { %v1080_v55 = vadd.f32 %v1163_v35, %v1010_v32 }
 0x445   :  { %1083 = vst [vmem:[%s1810_s9] sm:$0xff] %v1080_v55 }
 0x446   :  { %1088 = vsyncpa [#allocation3], 1 }
 0x447   :  { %1089 = vsyncpa [#allocation5], 1 }
 0x448   :  { %1090 = vsyncpa [#allocation8], 1 }

</bundles_post_ra>
